<compile_context>
chip_gen: v7x
topology: tpu7x:2x2x1
jax: 0.10.0
libtpu: 0.0.40
codegen_flags: <defaults>
</compile_context>

<pallas_src>
import functools

import jax
import jax.numpy as jnp
from jax.experimental import pallas as pl
from jax.experimental.pallas import tpu as pltpu


def _layernorm(x, gamma, beta, eps=1e-5):
    mu = jnp.mean(x, axis=-1, keepdims=True)
    var = jnp.mean((x - mu) ** 2, axis=-1, keepdims=True)
    return (x - mu) * jax.lax.rsqrt(var + eps) * gamma + beta


def encoder_block_kernel(
    xq_ref,                # (TM, E)  query-row tile of the flattened (T, E) slab
    xkv_ref,               # (T, E)   full token slab (resident; source of K/V)
    wq_ref, bq_ref,        # (E, E), (1, E)    Wq with 1/sqrt(hd) folded in
    wkv_ref, bkv_ref,      # (E, 2E), (1, 2E)  [Wk | Wv]
    wo_ref, bo_ref,        # (E, E), (1, E)
    w1_ref, b1_ref,        # (E, H), (1, H)
    w2_ref, b2_ref,        # (H, E), (1, E)
    g1_ref, beta1_ref,     # (1, E)
    g2_ref, beta2_ref,     # (1, E)
    out_ref,               # (TM, E)
    ctx_ref,               # (TM, E) f32 VMEM scratch: concatenated per-head contexts
    *, num_heads, batch, compute_dtype,
):
    TM, E = xq_ref.shape
    T = xkv_ref.shape[0]
    hd = E // num_heads

    xq = xq_ref[...].astype(jnp.float32)

    # Projections (MXU inputs in compute_dtype, f32 accumulation).
    q = jnp.dot(xq.astype(compute_dtype), wq_ref[...],
                preferred_element_type=jnp.float32) + bq_ref[...]
    kv = jnp.dot(xkv_ref[...].astype(compute_dtype), wkv_ref[...],
                 preferred_element_type=jnp.float32) + bkv_ref[...]

    # Block-diagonal batch mask generated in-kernel (no (T,T) HBM operand):
    # flattened row index = s*B + b, so same batch <=> (row % B) == (col % B).
    # Every row has at least one live (same-batch) entry, so the -1e30 mask is
    # safe under the row-max subtraction.  Mask/softmax stay in f32 always.
    q_off = pl.program_id(0) * TM
    q_rows = q_off + jax.lax.broadcasted_iota(jnp.int32, (TM, T), 0)
    k_cols = jax.lax.broadcasted_iota(jnp.int32, (TM, T), 1)
    same_batch = (q_rows % batch) == (k_cols % batch)

    # TODO(synk): at production T, replace the full-length K/V rows with
    # flash-style KV tiling (online-softmax m/l scratch) to bound VMEM.
    for h in range(num_heads):
        lo = h * hd
        qh = q[:, lo:lo + hd].astype(compute_dtype)
        kh = kv[:, lo:lo + hd].astype(compute_dtype)
        vh = kv[:, E + lo:E + lo + hd].astype(compute_dtype)

        s = jnp.einsum("qd,kd->qk", qh, kh, preferred_element_type=jnp.float32)
        s = jnp.where(same_batch, s, -1e30)
        s = s - jnp.max(s, axis=-1, keepdims=True)
        p = jnp.exp(s)
        p = p / jnp.sum(p, axis=-1, keepdims=True)   # exact divide (parity w/ ref)

        ctx_ref[:, lo:lo + hd] = jnp.dot(p.astype(compute_dtype), vh,
                                         preferred_element_type=jnp.float32)

    # Single fused W_o matmul over all heads (contraction = E, not hd).
    attn = jnp.dot(ctx_ref[...].astype(compute_dtype), wo_ref[...],
                   preferred_element_type=jnp.float32) + bo_ref[...]

    # Residual + LayerNorm 1 (f32).
    x1 = _layernorm(xq + attn, g1_ref[...], beta1_ref[...])

    # Feed-forward: Linear -> ReLU -> Linear (f32 accumulation).
    h1 = jnp.dot(x1.astype(compute_dtype), w1_ref[...],
                 preferred_element_type=jnp.float32) + b1_ref[...]
    h1 = jnp.maximum(h1, 0.0)
    ff = jnp.dot(h1.astype(compute_dtype), w2_ref[...],
                 preferred_element_type=jnp.float32) + b2_ref[...]

    # Residual + LayerNorm 2 (f32).
    out = _layernorm(x1 + ff, g2_ref[...], beta2_ref[...])
    out_ref[...] = out.astype(out_ref.dtype)


def _pick_row_tile(T):
    """Largest tile in {512,...,8} that divides T and gives a grid of >= 2."""
    for cand in (512, 256, 128, 64, 32, 16, 8):
        if cand < T and T % cand == 0:
            return cand
    return T


def _vmem_limit_bytes(requested):
    cap = 64 * 2 ** 20  # conservative default = v7x per-TensorCore VMEM
    try:
        cap = int(getattr(pltpu.get_tpu_info(), "vmem_capacity_bytes", cap))
    except Exception:
        pass
    return int(min(requested, (3 * cap) // 4))


def transformer_encoder_block(x, params, num_heads, compute_dtype=jnp.float32):
    """x: (S, B, E) float32 (seq-first, like PyTorch nn.MultiheadAttention default).

    compute_dtype controls MXU-input precision only (f32 accumulation, softmax,
    LayerNorm and residuals stay f32).  Use jnp.bfloat16 on v5e/v6e/v7x for
    ~2x MXU throughput and half the weight DMA bytes.
    """
    S, B, E = x.shape
    assert E % num_heads == 0
    (wq, wk, wv, bq, bk, bv, wo, bo,
     w1, b1, w2, b2, g1, beta1, g2, beta2) = params
    H = w1.shape[1]
    hd = E // num_heads
    T = S * B
    scale = 1.0 / (hd ** 0.5)

    # Host-side param prep: fold attention scale into Q projection, fuse K/V.
    wq_s = (wq * scale).astype(compute_dtype)
    bq_s = (bq * scale).astype(jnp.float32)
    wkv = jnp.concatenate([wk, wv], axis=1).astype(compute_dtype)
    bkv = jnp.concatenate([bk, bv], axis=1).astype(jnp.float32)
    wo_c = wo.astype(compute_dtype)
    w1_c = w1.astype(compute_dtype)
    w2_c = w2.astype(compute_dtype)

    xf = x.reshape(T, E)          # free reshape: no transpose, no data movement
    TM = _pick_row_tile(T)
    n_row_tiles = T // TM

    # x is passed twice: once tiled over query rows, once whole (for K/V).
    operands = [xf, xf, wq_s, bq_s, wkv, bkv, wo_c, bo,
                w1_c, b1, w2_c, b2, g1, beta1, g2, beta2]

    flops = (2 * T * E * E                              # Q projection
             + n_row_tiles * 2 * T * E * (2 * E)        # K/V projection (per tile)
             + 4 * T * T * E                            # QK^T and P.V
             + 2 * T * E * E                            # W_o
             + 4 * T * E * H)                           # FFN
    transcendentals = num_heads * T * T + 4 * T
    operand_bytes = sum(int(a.size) * a.dtype.itemsize for a in operands)
    bytes_accessed = operand_bytes + n_row_tiles * T * E * 4 + T * E * 4
    vmem_limit = _vmem_limit_bytes(max(32 * 2 ** 20, 8 * operand_bytes))

    kernel = functools.partial(encoder_block_kernel, num_heads=num_heads,
                               batch=B, compute_dtype=compute_dtype)

    def build_and_run(single_buffer_resident):
        def resident(shape):
            kw = {}
            if single_buffer_resident:
                # Grid-invariant block: skip useless double-buffering.
                kw["pipeline_mode"] = pl.Buffered(1)
            return pl.BlockSpec(shape, lambda i: (0,) * len(shape), **kw)

        in_specs = [
            pl.BlockSpec((TM, E), lambda i: (i, 0)),      # query-row tile
            resident((T, E)),                             # full slab (K/V source)
            resident((E, E)), resident((1, E)),           # wq (scaled), bq (scaled)
            resident((E, 2 * E)), resident((1, 2 * E)),   # wkv, bkv
            resident((E, E)), resident((1, E)),           # wo, bo
            resident((E, H)), resident((1, H)),           # w1, b1
            resident((H, E)), resident((1, E)),           # w2, b2
            resident((1, E)), resident((1, E)),           # ln1 gamma/beta
            resident((1, E)), resident((1, E)),           # ln2 gamma/beta
        ]
        # NOTE: at E=32 the output store is lane-masked; for production shapes
        # keep E (and H) multiples of 128 so the final vst is lane-dense.
        call = pl.pallas_call(
            kernel,
            out_shape=jax.ShapeDtypeStruct((T, E), x.dtype),
            grid_spec=pltpu.PrefetchScalarGridSpec(
                num_scalar_prefetch=0,
                grid=(n_row_tiles,),
                in_specs=in_specs,
                out_specs=pl.BlockSpec((TM, E), lambda i: (i, 0)),
                scratch_shapes=[pltpu.VMEM((TM, E), jnp.float32)],
            ),
            compiler_params=pltpu.CompilerParams(
                dimension_semantics=("parallel",),   # row tiles independent -> megacore
                vmem_limit_bytes=vmem_limit,
            ),
            cost_estimate=pl.CostEstimate(
                flops=int(flops),
                transcendentals=int(transcendentals),
                bytes_accessed=int(bytes_accessed),
            ),
        )
        return call(*operands)

    try:
        out = jax.block_until_ready(build_and_run(True))
    except Exception:
        # Fallback if this runtime rejects single-buffered (Buffered(1)) specs.
        out = build_and_run(False)

    return out.reshape(S, B, E)   # free reshape back to (S, B, E)


def reference(x, params, num_heads):
    """Pure-JAX reference mirroring the PyTorch module's forward semantics."""
    (wq, wk, wv, bq, bk, bv, wo, bo,
     w1, b1, w2, b2, g1, beta1, g2, beta2) = params
    S, B, E = x.shape
    hd = E // num_heads
    xb = jnp.transpose(x, (1, 0, 2))                # (B, S, E)

    q = xb @ wq + bq
    k = xb @ wk + bk
    v = xb @ wv + bv

    def split(t):                                   # (B, S, E) -> (B, nh, S, hd)
        return jnp.transpose(t.reshape(B, S, num_heads, hd), (0, 2, 1, 3))

    qh, kh, vh = split(q), split(k), split(v)
    s = jnp.einsum("bhqd,bhkd->bhqk", qh, kh) / (hd ** 0.5)
    p = jax.nn.softmax(s, axis=-1)
    o = jnp.einsum("bhqk,bhkd->bhqd", p, vh)
    o = jnp.transpose(o, (0, 2, 1, 3)).reshape(B, S, E)
    attn = o @ wo + bo

    def ln(t, g, bta, eps=1e-5):
        mu = jnp.mean(t, -1, keepdims=True)
        var = jnp.mean((t - mu) ** 2, -1, keepdims=True)
        return (t - mu) / jnp.sqrt(var + eps) * g + bta

    x1 = ln(xb + attn, g1, beta1)
    ff = jnp.maximum(x1 @ w1 + b1, 0.0) @ w2 + b2
    x2 = ln(x1 + ff, g2, beta2)
    return jnp.transpose(x2, (1, 0, 2))


def init_params(key, input_dim, num_heads, hidden_dim):
    E, H = input_dim, hidden_dim
    ks = jax.random.split(key, 12)
    sc = 0.05
    wq = jax.random.normal(ks[0], (E, E), jnp.float32) * sc
    wk = jax.random.normal(ks[1], (E, E), jnp.float32) * sc
    wv = jax.random.normal(ks[2], (E, E), jnp.float32) * sc
    bq = jax.random.normal(ks[3], (1, E), jnp.float32) * sc
    bk = jax.random.normal(ks[4], (1, E), jnp.float32) * sc
    bv = jax.random.normal(ks[5], (1, E), jnp.float32) * sc
    wo = jax.random.normal(ks[6], (E, E), jnp.float32) * sc
    bo = jax.random.normal(ks[7], (1, E), jnp.float32) * sc
    w1 = jax.random.normal(ks[8], (E, H), jnp.float32) * sc
    b1 = jax.random.normal(ks[9], (1, H), jnp.float32) * sc
    w2 = jax.random.normal(ks[10], (H, E), jnp.float32) * sc
    b2 = jax.random.normal(ks[11], (1, E), jnp.float32) * sc
    g1 = jnp.ones((1, E), jnp.float32)
    beta1 = jnp.zeros((1, E), jnp.float32)
    g2 = jnp.ones((1, E), jnp.float32)
    beta2 = jnp.zeros((1, E), jnp.float32)
    return (wq, wk, wv, bq, bk, bv, wo, bo, w1, b1, w2, b2, g1, beta1, g2, beta2)


if __name__ == "__main__":
    SEQ, BATCH, INPUT_DIM, NUM_HEADS, HIDDEN_DIM = 8, 2, 32, 4, 64

    key = jax.random.PRNGKey(0)
    kx, kp = jax.random.split(key)
    x = jax.random.normal(kx, (SEQ, BATCH, INPUT_DIM), jnp.float32)
    params = init_params(kp, INPUT_DIM, NUM_HEADS, HIDDEN_DIM)

    ref = reference(x, params, NUM_HEADS)

    # f32 MXU inputs: tight parity check (exact softmax divide, f32 everywhere).
    out_f32 = jax.block_until_ready(
        transformer_encoder_block(x, params, NUM_HEADS, compute_dtype=jnp.float32))
    assert out_f32.shape == (SEQ, BATCH, INPUT_DIM)
    assert jnp.allclose(out_f32, ref, atol=5e-3, rtol=5e-3), "f32 mismatch vs reference"

    # bf16 MXU inputs (f32 accumulate/softmax/LayerNorm): the recommended
    # production setting on v5e/v6e/v7x — looser tolerance by construction.
    out_bf16 = jax.block_until_ready(
        transformer_encoder_block(x, params, NUM_HEADS, compute_dtype=jnp.bfloat16))
    assert out_bf16.shape == (SEQ, BATCH, INPUT_DIM)
    assert jnp.allclose(out_bf16, ref, atol=5e-2, rtol=5e-2), "bf16 mismatch vs reference"

    print("KERNEL_OK")
</pallas_src>

<mosaic_0001>
module attributes {stable_mosaic.version = 11 : i64} {
  func.func @encoder_block_kernel(%arg0: i32, %arg1: memref<8x32xf32, #tpu.memory_space<vmem>>, %arg2: memref<16x32xf32, #tpu.memory_space<vmem>>, %arg3: memref<32x32xf32, #tpu.memory_space<vmem>>, %arg4: memref<1x32xf32, #tpu.memory_space<vmem>>, %arg5: memref<32x64xf32, #tpu.memory_space<vmem>>, %arg6: memref<1x64xf32, #tpu.memory_space<vmem>>, %arg7: memref<32x32xf32, #tpu.memory_space<vmem>>, %arg8: memref<1x32xf32, #tpu.memory_space<vmem>>, %arg9: memref<32x64xf32, #tpu.memory_space<vmem>>, %arg10: memref<1x64xf32, #tpu.memory_space<vmem>>, %arg11: memref<64x32xf32, #tpu.memory_space<vmem>>, %arg12: memref<1x32xf32, #tpu.memory_space<vmem>>, %arg13: memref<1x32xf32, #tpu.memory_space<vmem>>, %arg14: memref<1x32xf32, #tpu.memory_space<vmem>>, %arg15: memref<1x32xf32, #tpu.memory_space<vmem>>, %arg16: memref<1x32xf32, #tpu.memory_space<vmem>>, %arg17: memref<8x32xf32, #tpu.memory_space<vmem>>, %arg18: memref<8x32xf32, #tpu.memory_space<vmem>>) attributes {dimension_semantics = [#tpu.dimension_semantics<parallel>], iteration_bounds = array<i64: 2>, scalar_prefetch = 0 : i64, scratch_operands = 1 : i64, tpu.core_type = #tpu.core_type<tc>, window_params = [{transform_indices = @transform_0, window_bounds = array<i64: 8, 32>}, {pipeline_mode = #tpu.pipeline_mode<synchronous>, transform_indices = @transform_1, window_bounds = array<i64: 16, 32>}, {pipeline_mode = #tpu.pipeline_mode<synchronous>, transform_indices = @transform_2, window_bounds = array<i64: 32, 32>}, {pipeline_mode = #tpu.pipeline_mode<synchronous>, transform_indices = @transform_3, window_bounds = array<i64: 1, 32>}, {pipeline_mode = #tpu.pipeline_mode<synchronous>, transform_indices = @transform_4, window_bounds = array<i64: 32, 64>}, {pipeline_mode = #tpu.pipeline_mode<synchronous>, transform_indices = @transform_5, window_bounds = array<i64: 1, 64>}, {pipeline_mode = #tpu.pipeline_mode<synchronous>, transform_indices = @transform_6, window_bounds = array<i64: 32, 32>}, {pipeline_mode = #tpu.pipeline_mode<synchronous>, transform_indices = @transform_7, window_bounds = array<i64: 1, 32>}, {pipeline_mode = #tpu.pipeline_mode<synchronous>, transform_indices = @transform_8, window_bounds = array<i64: 32, 64>}, {pipeline_mode = #tpu.pipeline_mode<synchronous>, transform_indices = @transform_9, window_bounds = array<i64: 1, 64>}, {pipeline_mode = #tpu.pipeline_mode<synchronous>, transform_indices = @transform_10, window_bounds = array<i64: 64, 32>}, {pipeline_mode = #tpu.pipeline_mode<synchronous>, transform_indices = @transform_11, window_bounds = array<i64: 1, 32>}, {pipeline_mode = #tpu.pipeline_mode<synchronous>, transform_indices = @transform_12, window_bounds = array<i64: 1, 32>}, {pipeline_mode = #tpu.pipeline_mode<synchronous>, transform_indices = @transform_13, window_bounds = array<i64: 1, 32>}, {pipeline_mode = #tpu.pipeline_mode<synchronous>, transform_indices = @transform_14, window_bounds = array<i64: 1, 32>}, {pipeline_mode = #tpu.pipeline_mode<synchronous>, transform_indices = @transform_15, window_bounds = array<i64: 1, 32>}, {transform_indices = @transform_16, window_bounds = array<i64: 8, 32>}]} {
    %c0 = arith.constant 0 : index
    %c0_0 = arith.constant 0 : index
    %0 = vector.load %arg1[%c0, %c0_0] : memref<8x32xf32, #tpu.memory_space<vmem>>, vector<8x32xf32>
    %c0_1 = arith.constant 0 : index
    %c0_2 = arith.constant 0 : index
    %1 = vector.load %arg3[%c0_1, %c0_2] : memref<32x32xf32, #tpu.memory_space<vmem>>, vector<32x32xf32>
    %cst = arith.constant dense<0.000000e+00> : vector<8x32xf32>
    %2 = tpu.matmul %0, %1, %cst {dimension_numbers = #tpu.dot_dimension_numbers<[1], [0], [0], [1], [0, 0, 1, 1], [], []>} : vector<8x32xf32>, vector<32x32xf32>, vector<8x32xf32> -> vector<8x32xf32>
    %c0_3 = arith.constant 0 : index
    %c0_4 = arith.constant 0 : index
    %3 = vector.load %arg4[%c0_3, %c0_4] : memref<1x32xf32, #tpu.memory_space<vmem>>, vector<1x32xf32>
    %4 = vector.broadcast %3 : vector<1x32xf32> to vector<8x32xf32>
    %5 = arith.addf %2, %4 : vector<8x32xf32>
    %c0_5 = arith.constant 0 : index
    %c0_6 = arith.constant 0 : index
    %6 = vector.load %arg2[%c0_5, %c0_6] : memref<16x32xf32, #tpu.memory_space<vmem>>, vector<16x32xf32>
    %c0_7 = arith.constant 0 : index
    %c0_8 = arith.constant 0 : index
    %7 = vector.load %arg5[%c0_7, %c0_8] : memref<32x64xf32, #tpu.memory_space<vmem>>, vector<32x64xf32>
    %cst_9 = arith.constant dense<0.000000e+00> : vector<16x64xf32>
    %8 = tpu.matmul %6, %7, %cst_9 {dimension_numbers = #tpu.dot_dimension_numbers<[1], [0], [0], [1], [0, 0, 1, 1], [], []>} : vector<16x32xf32>, vector<32x64xf32>, vector<16x64xf32> -> vector<16x64xf32>
    %c0_10 = arith.constant 0 : index
    %c0_11 = arith.constant 0 : index
    %9 = vector.load %arg6[%c0_10, %c0_11] : memref<1x64xf32, #tpu.memory_space<vmem>>, vector<1x64xf32>
    %10 = vector.broadcast %9 : vector<1x64xf32> to vector<16x64xf32>
    %11 = arith.addf %8, %10 : vector<16x64xf32>
    %c8_i32 = arith.constant 8 : i32
    %12 = arith.muli %arg0, %c8_i32 : i32
    %13 = tpu.iota {dimensions = array<i32: 0>} : vector<8x16xi32>
    %14 = vector.broadcast %12 : i32 to vector<8x16xi32>
    %15 = arith.addi %14, %13 : vector<8x16xi32>
    %16 = tpu.iota {dimensions = array<i32: 1>} : vector<8x16xi32>
    %c2_i32 = arith.constant 2 : i32
    %c0_i32 = arith.constant 0 : i32
    %17 = arith.cmpi eq, %c2_i32, %c0_i32 : i32
    %c1_i32 = arith.constant 1 : i32
    %18 = arith.select %17, %c1_i32, %c2_i32 : i32
    %19 = vector.broadcast %18 : i32 to vector<8x16xi32>
    %20 = arith.remsi %15, %19 : vector<8x16xi32>
    %c0_i32_12 = arith.constant 0 : i32
    %21 = vector.broadcast %c0_i32_12 : i32 to vector<8x16xi32>
    %22 = arith.cmpi ne, %20, %21 : vector<8x16xi32>
    %c0_i32_13 = arith.constant 0 : i32
    %23 = vector.broadcast %c0_i32_13 : i32 to vector<8x16xi32>
    %24 = arith.cmpi slt, %20, %23 : vector<8x16xi32>
    %c0_i32_14 = arith.constant 0 : i32
    %25 = arith.cmpi slt, %18, %c0_i32_14 : i32
    %26 = vector.broadcast %25 : i1 to vector<8x16xi1>
    %27 = vector.broadcast %26 : vector<8x16xi1> to vector<8x16xi1>
    %28 = arith.xori %24, %27 : vector<8x16xi1>
    %29 = arith.andi %28, %22 : vector<8x16xi1>
    %30 = vector.broadcast %18 : i32 to vector<8x16xi32>
    %31 = arith.addi %20, %30 : vector<8x16xi32>
    %32 = arith.select %29, %31, %20 : vector<8x16xi1>, vector<8x16xi32>
    %c2_i32_15 = arith.constant 2 : i32
    %c0_i32_16 = arith.constant 0 : i32
    %33 = arith.cmpi eq, %c2_i32_15, %c0_i32_16 : i32
    %c1_i32_17 = arith.constant 1 : i32
    %34 = arith.select %33, %c1_i32_17, %c2_i32_15 : i32
    %35 = vector.broadcast %34 : i32 to vector<8x16xi32>
    %36 = arith.remsi %16, %35 : vector<8x16xi32>
    %c0_i32_18 = arith.constant 0 : i32
    %37 = vector.broadcast %c0_i32_18 : i32 to vector<8x16xi32>
    %38 = arith.cmpi ne, %36, %37 : vector<8x16xi32>
    %c0_i32_19 = arith.constant 0 : i32
    %39 = vector.broadcast %c0_i32_19 : i32 to vector<8x16xi32>
    %40 = arith.cmpi slt, %36, %39 : vector<8x16xi32>
    %c0_i32_20 = arith.constant 0 : i32
    %41 = arith.cmpi slt, %34, %c0_i32_20 : i32
    %42 = vector.broadcast %41 : i1 to vector<8x16xi1>
    %43 = vector.broadcast %42 : vector<8x16xi1> to vector<8x16xi1>
    %44 = arith.xori %40, %43 : vector<8x16xi1>
    %45 = arith.andi %44, %38 : vector<8x16xi1>
    %46 = vector.broadcast %34 : i32 to vector<8x16xi32>
    %47 = arith.addi %36, %46 : vector<8x16xi32>
    %48 = arith.select %45, %47, %36 : vector<8x16xi1>, vector<8x16xi32>
    %49 = arith.cmpi eq, %32, %48 : vector<8x16xi32>
    %50 = vector.extract_strided_slice %5 {offsets = [0, 0], sizes = [8, 8], strides = [1, 1]} : vector<8x32xf32> to vector<8x8xf32>
    %51 = vector.extract_strided_slice %11 {offsets = [0, 0], sizes = [16, 8], strides = [1, 1]} : vector<16x64xf32> to vector<16x8xf32>
    %52 = vector.extract_strided_slice %11 {offsets = [0, 32], sizes = [16, 8], strides = [1, 1]} : vector<16x64xf32> to vector<16x8xf32>
    "tpu.trace_start"() <{level = 10 : i32, message = "qd,kd->qk"}> : () -> ()
    %cst_21 = arith.constant dense<0.000000e+00> : vector<8x16xf32>
    %53 = tpu.matmul %50, %51, %cst_21 {dimension_numbers = #tpu.dot_dimension_numbers<[1], [1], [0], [0], [0, 0, 1, 0], [], []>} : vector<8x8xf32>, vector<16x8xf32>, vector<8x16xf32> -> vector<8x16xf32>
    %cst_22 = arith.constant -1.000000e+30 : f32
    "tpu.trace_stop"() : () -> ()
    %54 = vector.broadcast %cst_22 : f32 to vector<8x16xf32>
    %55 = arith.select %49, %53, %54 : vector<8x16xi1>, vector<8x16xf32>
    %cst_23 = arith.constant dense<0xFF800000> : vector<8xf32>
    %56 = vector.multi_reduction <maximumf>, %55, %cst_23 [1] : vector<8x16xf32> to vector<8xf32>
    %57 = vector.shape_cast %56 : vector<8xf32> to vector<8x1xf32>
    %58 = vector.broadcast %57 : vector<8x1xf32> to vector<8x16xf32>
    %59 = arith.subf %55, %58 : vector<8x16xf32>
    %60 = math.exp %59 : vector<8x16xf32>
    %cst_24 = arith.constant dense<0.000000e+00> : vector<8xf32>
    %61 = vector.multi_reduction <add>, %60, %cst_24 [1] : vector<8x16xf32> to vector<8xf32>
    %62 = vector.shape_cast %61 : vector<8xf32> to vector<8x1xf32>
    %63 = vector.broadcast %62 : vector<8x1xf32> to vector<8x16xf32>
    %64 = arith.divf %60, %63 : vector<8x16xf32>
    %cst_25 = arith.constant dense<0.000000e+00> : vector<8x8xf32>
    %65 = tpu.matmul %64, %52, %cst_25 {dimension_numbers = #tpu.dot_dimension_numbers<[1], [0], [0], [1], [0, 0, 1, 1], [], []>} : vector<8x16xf32>, vector<16x8xf32>, vector<8x8xf32> -> vector<8x8xf32>
    %c0_26 = arith.constant 0 : index
    %c0_27 = arith.constant 0 : index
    %66 = vector.load %arg18[%c0_26, %c0_27] : memref<8x32xf32, #tpu.memory_space<vmem>>, vector<8x8xf32>
    tpu.vector_store %arg18[%c0_26, %c0_27], %65 {strides = array<i32>} : memref<8x32xf32, #tpu.memory_space<vmem>>, vector<8x8xf32>,
    %67 = vector.extract_strided_slice %5 {offsets = [0, 8], sizes = [8, 8], strides = [1, 1]} : vector<8x32xf32> to vector<8x8xf32>
    %68 = vector.extract_strided_slice %11 {offsets = [0, 8], sizes = [16, 8], strides = [1, 1]} : vector<16x64xf32> to vector<16x8xf32>
    %69 = vector.extract_strided_slice %11 {offsets = [0, 40], sizes = [16, 8], strides = [1, 1]} : vector<16x64xf32> to vector<16x8xf32>
    "tpu.trace_start"() <{level = 10 : i32, message = "qd,kd->qk"}> : () -> ()
    %cst_28 = arith.constant dense<0.000000e+00> : vector<8x16xf32>
    %70 = tpu.matmul %67, %68, %cst_28 {dimension_numbers = #tpu.dot_dimension_numbers<[1], [1], [0], [0], [0, 0, 1, 0], [], []>} : vector<8x8xf32>, vector<16x8xf32>, vector<8x16xf32> -> vector<8x16xf32>
    %cst_29 = arith.constant -1.000000e+30 : f32
    "tpu.trace_stop"() : () -> ()
    %71 = vector.broadcast %cst_29 : f32 to vector<8x16xf32>
    %72 = arith.select %49, %70, %71 : vector<8x16xi1>, vector<8x16xf32>
    %cst_30 = arith.constant dense<0xFF800000> : vector<8xf32>
    %73 = vector.multi_reduction <maximumf>, %72, %cst_30 [1] : vector<8x16xf32> to vector<8xf32>
    %74 = vector.shape_cast %73 : vector<8xf32> to vector<8x1xf32>
    %75 = vector.broadcast %74 : vector<8x1xf32> to vector<8x16xf32>
    %76 = arith.subf %72, %75 : vector<8x16xf32>
    %77 = math.exp %76 : vector<8x16xf32>
    %cst_31 = arith.constant dense<0.000000e+00> : vector<8xf32>
    %78 = vector.multi_reduction <add>, %77, %cst_31 [1] : vector<8x16xf32> to vector<8xf32>
    %79 = vector.shape_cast %78 : vector<8xf32> to vector<8x1xf32>
    %80 = vector.broadcast %79 : vector<8x1xf32> to vector<8x16xf32>
    %81 = arith.divf %77, %80 : vector<8x16xf32>
    %cst_32 = arith.constant dense<0.000000e+00> : vector<8x8xf32>
    %82 = tpu.matmul %81, %69, %cst_32 {dimension_numbers = #tpu.dot_dimension_numbers<[1], [0], [0], [1], [0, 0, 1, 1], [], []>} : vector<8x16xf32>, vector<16x8xf32>, vector<8x8xf32> -> vector<8x8xf32>
    %c0_33 = arith.constant 0 : index
    %c8 = arith.constant 8 : index
    %83 = vector.load %arg18[%c0_33, %c8] : memref<8x32xf32, #tpu.memory_space<vmem>>, vector<8x8xf32>
    tpu.vector_store %arg18[%c0_33, %c8], %82 {strides = array<i32>} : memref<8x32xf32, #tpu.memory_space<vmem>>, vector<8x8xf32>,
    %84 = vector.extract_strided_slice %5 {offsets = [0, 16], sizes = [8, 8], strides = [1, 1]} : vector<8x32xf32> to vector<8x8xf32>
    %85 = vector.extract_strided_slice %11 {offsets = [0, 16], sizes = [16, 8], strides = [1, 1]} : vector<16x64xf32> to vector<16x8xf32>
    %86 = vector.extract_strided_slice %11 {offsets = [0, 48], sizes = [16, 8], strides = [1, 1]} : vector<16x64xf32> to vector<16x8xf32>
    "tpu.trace_start"() <{level = 10 : i32, message = "qd,kd->qk"}> : () -> ()
    %cst_34 = arith.constant dense<0.000000e+00> : vector<8x16xf32>
    %87 = tpu.matmul %84, %85, %cst_34 {dimension_numbers = #tpu.dot_dimension_numbers<[1], [1], [0], [0], [0, 0, 1, 0], [], []>} : vector<8x8xf32>, vector<16x8xf32>, vector<8x16xf32> -> vector<8x16xf32>
    %cst_35 = arith.constant -1.000000e+30 : f32
    "tpu.trace_stop"() : () -> ()
    %88 = vector.broadcast %cst_35 : f32 to vector<8x16xf32>
    %89 = arith.select %49, %87, %88 : vector<8x16xi1>, vector<8x16xf32>
    %cst_36 = arith.constant dense<0xFF800000> : vector<8xf32>
    %90 = vector.multi_reduction <maximumf>, %89, %cst_36 [1] : vector<8x16xf32> to vector<8xf32>
    %91 = vector.shape_cast %90 : vector<8xf32> to vector<8x1xf32>
    %92 = vector.broadcast %91 : vector<8x1xf32> to vector<8x16xf32>
    %93 = arith.subf %89, %92 : vector<8x16xf32>
    %94 = math.exp %93 : vector<8x16xf32>
    %cst_37 = arith.constant dense<0.000000e+00> : vector<8xf32>
    %95 = vector.multi_reduction <add>, %94, %cst_37 [1] : vector<8x16xf32> to vector<8xf32>
    %96 = vector.shape_cast %95 : vector<8xf32> to vector<8x1xf32>
    %97 = vector.broadcast %96 : vector<8x1xf32> to vector<8x16xf32>
    %98 = arith.divf %94, %97 : vector<8x16xf32>
    %cst_38 = arith.constant dense<0.000000e+00> : vector<8x8xf32>
    %99 = tpu.matmul %98, %86, %cst_38 {dimension_numbers = #tpu.dot_dimension_numbers<[1], [0], [0], [1], [0, 0, 1, 1], [], []>} : vector<8x16xf32>, vector<16x8xf32>, vector<8x8xf32> -> vector<8x8xf32>
    %c0_39 = arith.constant 0 : index
    %c16 = arith.constant 16 : index
    %100 = vector.load %arg18[%c0_39, %c16] : memref<8x32xf32, #tpu.memory_space<vmem>>, vector<8x8xf32>
    tpu.vector_store %arg18[%c0_39, %c16], %99 {strides = array<i32>} : memref<8x32xf32, #tpu.memory_space<vmem>>, vector<8x8xf32>,
    %101 = vector.extract_strided_slice %5 {offsets = [0, 24], sizes = [8, 8], strides = [1, 1]} : vector<8x32xf32> to vector<8x8xf32>
    %102 = vector.extract_strided_slice %11 {offsets = [0, 24], sizes = [16, 8], strides = [1, 1]} : vector<16x64xf32> to vector<16x8xf32>
    %103 = vector.extract_strided_slice %11 {offsets = [0, 56], sizes = [16, 8], strides = [1, 1]} : vector<16x64xf32> to vector<16x8xf32>
    "tpu.trace_start"() <{level = 10 : i32, message = "qd,kd->qk"}> : () -> ()
    %cst_40 = arith.constant dense<0.000000e+00> : vector<8x16xf32>
    %104 = tpu.matmul %101, %102, %cst_40 {dimension_numbers = #tpu.dot_dimension_numbers<[1], [1], [0], [0], [0, 0, 1, 0], [], []>} : vector<8x8xf32>, vector<16x8xf32>, vector<8x16xf32> -> vector<8x16xf32>
    %cst_41 = arith.constant -1.000000e+30 : f32
    "tpu.trace_stop"() : () -> ()
    %105 = vector.broadcast %cst_41 : f32 to vector<8x16xf32>
    %106 = arith.select %49, %104, %105 : vector<8x16xi1>, vector<8x16xf32>
    %cst_42 = arith.constant dense<0xFF800000> : vector<8xf32>
    %107 = vector.multi_reduction <maximumf>, %106, %cst_42 [1] : vector<8x16xf32> to vector<8xf32>
    %108 = vector.shape_cast %107 : vector<8xf32> to vector<8x1xf32>
    %109 = vector.broadcast %108 : vector<8x1xf32> to vector<8x16xf32>
    %110 = arith.subf %106, %109 : vector<8x16xf32>
    %111 = math.exp %110 : vector<8x16xf32>
    %cst_43 = arith.constant dense<0.000000e+00> : vector<8xf32>
    %112 = vector.multi_reduction <add>, %111, %cst_43 [1] : vector<8x16xf32> to vector<8xf32>
    %113 = vector.shape_cast %112 : vector<8xf32> to vector<8x1xf32>
    %114 = vector.broadcast %113 : vector<8x1xf32> to vector<8x16xf32>
    %115 = arith.divf %111, %114 : vector<8x16xf32>
    %cst_44 = arith.constant dense<0.000000e+00> : vector<8x8xf32>
    %116 = tpu.matmul %115, %103, %cst_44 {dimension_numbers = #tpu.dot_dimension_numbers<[1], [0], [0], [1], [0, 0, 1, 1], [], []>} : vector<8x16xf32>, vector<16x8xf32>, vector<8x8xf32> -> vector<8x8xf32>
    %c0_45 = arith.constant 0 : index
    %c24 = arith.constant 24 : index
    %117 = vector.load %arg18[%c0_45, %c24] : memref<8x32xf32, #tpu.memory_space<vmem>>, vector<8x8xf32>
    tpu.vector_store %arg18[%c0_45, %c24], %116 {strides = array<i32>} : memref<8x32xf32, #tpu.memory_space<vmem>>, vector<8x8xf32>,
    %c0_46 = arith.constant 0 : index
    %c0_47 = arith.constant 0 : index
    %118 = vector.load %arg18[%c0_46, %c0_47] : memref<8x32xf32, #tpu.memory_space<vmem>>, vector<8x32xf32>
    %c0_48 = arith.constant 0 : index
    %c0_49 = arith.constant 0 : index
    %119 = vector.load %arg7[%c0_48, %c0_49] : memref<32x32xf32, #tpu.memory_space<vmem>>, vector<32x32xf32>
    %cst_50 = arith.constant dense<0.000000e+00> : vector<8x32xf32>
    %120 = tpu.matmul %118, %119, %cst_50 {dimension_numbers = #tpu.dot_dimension_numbers<[1], [0], [0], [1], [0, 0, 1, 1], [], []>} : vector<8x32xf32>, vector<32x32xf32>, vector<8x32xf32> -> vector<8x32xf32>
    %c0_51 = arith.constant 0 : index
    %c0_52 = arith.constant 0 : index
    %121 = vector.load %arg8[%c0_51, %c0_52] : memref<1x32xf32, #tpu.memory_space<vmem>>, vector<1x32xf32>
    %122 = vector.broadcast %121 : vector<1x32xf32> to vector<8x32xf32>
    %123 = arith.addf %120, %122 : vector<8x32xf32>
    %124 = arith.addf %0, %123 : vector<8x32xf32>
    %c0_53 = arith.constant 0 : index
    %c0_54 = arith.constant 0 : index
    %125 = vector.load %arg13[%c0_53, %c0_54] : memref<1x32xf32, #tpu.memory_space<vmem>>, vector<1x32xf32>
    %c0_55 = arith.constant 0 : index
    %c0_56 = arith.constant 0 : index
    %126 = vector.load %arg14[%c0_55, %c0_56] : memref<1x32xf32, #tpu.memory_space<vmem>>, vector<1x32xf32>
    %cst_57 = arith.constant dense<0.000000e+00> : vector<8xf32>
    %127 = vector.multi_reduction <add>, %124, %cst_57 [1] : vector<8x32xf32> to vector<8xf32>
    %128 = vector.shape_cast %127 : vector<8xf32> to vector<8x1xf32>
    %cst_58 = arith.constant 3.200000e+01 : f32
    %129 = vector.broadcast %cst_58 : f32 to vector<8x1xf32>
    %130 = arith.divf %128, %129 : vector<8x1xf32>
    %131 = vector.broadcast %130 : vector<8x1xf32> to vector<8x32xf32>
    %132 = arith.subf %124, %131 : vector<8x32xf32>
    %133 = arith.mulf %132, %132 : vector<8x32xf32>
    %cst_59 = arith.constant dense<0.000000e+00> : vector<8xf32>
    %134 = vector.multi_reduction <add>, %133, %cst_59 [1] : vector<8x32xf32> to vector<8xf32>
    %135 = vector.shape_cast %134 : vector<8xf32> to vector<8x1xf32>
    %cst_60 = arith.constant 3.200000e+01 : f32
    %136 = vector.broadcast %cst_60 : f32 to vector<8x1xf32>
    %137 = arith.divf %135, %136 : vector<8x1xf32>
    %138 = vector.broadcast %130 : vector<8x1xf32> to vector<8x32xf32>
    %139 = arith.subf %124, %138 : vector<8x32xf32>
    %cst_61 = arith.constant 9.99999974E-6 : f32
    %140 = vector.broadcast %cst_61 : f32 to vector<8x1xf32>
    %141 = arith.addf %137, %140 : vector<8x1xf32>
    %142 = math.rsqrt %141 : vector<8x1xf32>
    %143 = vector.broadcast %142 : vector<8x1xf32> to vector<8x32xf32>
    %144 = arith.mulf %139, %143 : vector<8x32xf32>
    %145 = vector.broadcast %125 : vector<1x32xf32> to vector<8x32xf32>
    %146 = arith.mulf %144, %145 : vector<8x32xf32>
    %147 = vector.broadcast %126 : vector<1x32xf32> to vector<8x32xf32>
    %148 = arith.addf %146, %147 : vector<8x32xf32>
    %c0_62 = arith.constant 0 : index
    %c0_63 = arith.constant 0 : index
    %149 = vector.load %arg9[%c0_62, %c0_63] : memref<32x64xf32, #tpu.memory_space<vmem>>, vector<32x64xf32>
    %cst_64 = arith.constant dense<0.000000e+00> : vector<8x64xf32>
    %150 = tpu.matmul %148, %149, %cst_64 {dimension_numbers = #tpu.dot_dimension_numbers<[1], [0], [0], [1], [0, 0, 1, 1], [], []>} : vector<8x32xf32>, vector<32x64xf32>, vector<8x64xf32> -> vector<8x64xf32>
    %c0_65 = arith.constant 0 : index
    %c0_66 = arith.constant 0 : index
    %151 = vector.load %arg10[%c0_65, %c0_66] : memref<1x64xf32, #tpu.memory_space<vmem>>, vector<1x64xf32>
    %152 = vector.broadcast %151 : vector<1x64xf32> to vector<8x64xf32>
    %153 = arith.addf %150, %152 : vector<8x64xf32>
    %cst_67 = arith.constant 0.000000e+00 : f32
    %154 = vector.broadcast %cst_67 : f32 to vector<8x64xf32>
    %155 = arith.maximumf %153, %154 : vector<8x64xf32>
    %c0_68 = arith.constant 0 : index
    %c0_69 = arith.constant 0 : index
    %156 = vector.load %arg11[%c0_68, %c0_69] : memref<64x32xf32, #tpu.memory_space<vmem>>, vector<64x32xf32>
    %cst_70 = arith.constant dense<0.000000e+00> : vector<8x32xf32>
    %157 = tpu.matmul %155, %156, %cst_70 {dimension_numbers = #tpu.dot_dimension_numbers<[1], [0], [0], [1], [0, 0, 1, 1], [], []>} : vector<8x64xf32>, vector<64x32xf32>, vector<8x32xf32> -> vector<8x32xf32>
    %c0_71 = arith.constant 0 : index
    %c0_72 = arith.constant 0 : index
    %158 = vector.load %arg12[%c0_71, %c0_72] : memref<1x32xf32, #tpu.memory_space<vmem>>, vector<1x32xf32>
    %159 = vector.broadcast %158 : vector<1x32xf32> to vector<8x32xf32>
    %160 = arith.addf %157, %159 : vector<8x32xf32>
    %161 = arith.addf %148, %160 : vector<8x32xf32>
    %c0_73 = arith.constant 0 : index
    %c0_74 = arith.constant 0 : index
    %162 = vector.load %arg15[%c0_73, %c0_74] : memref<1x32xf32, #tpu.memory_space<vmem>>, vector<1x32xf32>
    %c0_75 = arith.constant 0 : index
    %c0_76 = arith.constant 0 : index
    %163 = vector.load %arg16[%c0_75, %c0_76] : memref<1x32xf32, #tpu.memory_space<vmem>>, vector<1x32xf32>
    %cst_77 = arith.constant dense<0.000000e+00> : vector<8xf32>
    %164 = vector.multi_reduction <add>, %161, %cst_77 [1] : vector<8x32xf32> to vector<8xf32>
    %165 = vector.shape_cast %164 : vector<8xf32> to vector<8x1xf32>
    %cst_78 = arith.constant 3.200000e+01 : f32
    %166 = vector.broadcast %cst_78 : f32 to vector<8x1xf32>
    %167 = arith.divf %165, %166 : vector<8x1xf32>
    %168 = vector.broadcast %167 : vector<8x1xf32> to vector<8x32xf32>
    %169 = arith.subf %161, %168 : vector<8x32xf32>
    %170 = arith.mulf %169, %169 : vector<8x32xf32>
    %cst_79 = arith.constant dense<0.000000e+00> : vector<8xf32>
    %171 = vector.multi_reduction <add>, %170, %cst_79 [1] : vector<8x32xf32> to vector<8xf32>
    %172 = vector.shape_cast %171 : vector<8xf32> to vector<8x1xf32>
    %cst_80 = arith.constant 3.200000e+01 : f32
    %173 = vector.broadcast %cst_80 : f32 to vector<8x1xf32>
    %174 = arith.divf %172, %173 : vector<8x1xf32>
    %175 = vector.broadcast %167 : vector<8x1xf32> to vector<8x32xf32>
    %176 = arith.subf %161, %175 : vector<8x32xf32>
    %cst_81 = arith.constant 9.99999974E-6 : f32
    %177 = vector.broadcast %cst_81 : f32 to vector<8x1xf32>
    %178 = arith.addf %174, %177 : vector<8x1xf32>
    %179 = math.rsqrt %178 : vector<8x1xf32>
    %180 = vector.broadcast %179 : vector<8x1xf32> to vector<8x32xf32>
    %181 = arith.mulf %176, %180 : vector<8x32xf32>
    %182 = vector.broadcast %162 : vector<1x32xf32> to vector<8x32xf32>
    %183 = arith.mulf %181, %182 : vector<8x32xf32>
    %184 = vector.broadcast %163 : vector<1x32xf32> to vector<8x32xf32>
    %185 = arith.addf %183, %184 : vector<8x32xf32>
    %c0_82 = arith.constant 0 : index
    %c0_83 = arith.constant 0 : index
    %186 = vector.load %arg17[%c0_82, %c0_83] : memref<8x32xf32, #tpu.memory_space<vmem>>, vector<8x32xf32>
    tpu.vector_store %arg17[%c0_82, %c0_83], %185 {strides = array<i32>} : memref<8x32xf32, #tpu.memory_space<vmem>>, vector<8x32xf32>,
    return
  }
  func.func @transform_0(%arg0: i32) -> (i32, i32) {
    %c0_i32 = arith.constant 0 : i32
    %c0_i32_0 = arith.constant 0 : i32
    return %arg0, %c0_i32 : i32, i32
  }
  func.func @transform_1(%arg0: i32) -> (i32, i32) {
    %c0_i32 = arith.constant 0 : i32
    %c0_i32_0 = arith.constant 0 : i32
    %c0_i32_1 = arith.constant 0 : i32
    return %c0_i32, %c0_i32_0 : i32, i32
  }
  func.func @transform_2(%arg0: i32) -> (i32, i32) {
    %c0_i32 = arith.constant 0 : i32
    %c0_i32_0 = arith.constant 0 : i32
    %c0_i32_1 = arith.constant 0 : i32
    return %c0_i32, %c0_i32_0 : i32, i32
  }
  func.func @transform_3(%arg0: i32) -> (i32, i32) {
    %c0_i32 = arith.constant 0 : i32
    %c0_i32_0 = arith.constant 0 : i32
    %c0_i32_1 = arith.constant 0 : i32
    return %c0_i32, %c0_i32_0 : i32, i32
  }
  func.func @transform_4(%arg0: i32) -> (i32, i32) {
    %c0_i32 = arith.constant 0 : i32
    %c0_i32_0 = arith.constant 0 : i32
    %c0_i32_1 = arith.constant 0 : i32
    return %c0_i32, %c0_i32_0 : i32, i32
  }
  func.func @transform_5(%arg0: i32) -> (i32, i32) {
    %c0_i32 = arith.constant 0 : i32
    %c0_i32_0 = arith.constant 0 : i32
    %c0_i32_1 = arith.constant 0 : i32
    return %c0_i32, %c0_i32_0 : i32, i32
  }
  func.func @transform_6(%arg0: i32) -> (i32, i32) {
    %c0_i32 = arith.constant 0 : i32
    %c0_i32_0 = arith.constant 0 : i32
    %c0_i32_1 = arith.constant 0 : i32
    return %c0_i32, %c0_i32_0 : i32, i32
  }
  func.func @transform_7(%arg0: i32) -> (i32, i32) {
    %c0_i32 = arith.constant 0 : i32
    %c0_i32_0 = arith.constant 0 : i32
    %c0_i32_1 = arith.constant 0 : i32
    return %c0_i32, %c0_i32_0 : i32, i32
  }
  func.func @transform_8(%arg0: i32) -> (i32, i32) {
    %c0_i32 = arith.constant 0 : i32
    %c0_i32_0 = arith.constant 0 : i32
    %c0_i32_1 = arith.constant 0 : i32
    return %c0_i32, %c0_i32_0 : i32, i32
  }
  func.func @transform_9(%arg0: i32) -> (i32, i32) {
    %c0_i32 = arith.constant 0 : i32
    %c0_i32_0 = arith.constant 0 : i32
    %c0_i32_1 = arith.constant 0 : i32
    return %c0_i32, %c0_i32_0 : i32, i32
  }
  func.func @transform_10(%arg0: i32) -> (i32, i32) {
    %c0_i32 = arith.constant 0 : i32
    %c0_i32_0 = arith.constant 0 : i32
    %c0_i32_1 = arith.constant 0 : i32
    return %c0_i32, %c0_i32_0 : i32, i32
  }
  func.func @transform_11(%arg0: i32) -> (i32, i32) {
    %c0_i32 = arith.constant 0 : i32
    %c0_i32_0 = arith.constant 0 : i32
    %c0_i32_1 = arith.constant 0 : i32
    return %c0_i32, %c0_i32_0 : i32, i32
  }
  func.func @transform_12(%arg0: i32) -> (i32, i32) {
    %c0_i32 = arith.constant 0 : i32
    %c0_i32_0 = arith.constant 0 : i32
    %c0_i32_1 = arith.constant 0 : i32
    return %c0_i32, %c0_i32_0 : i32, i32
  }
  func.func @transform_13(%arg0: i32) -> (i32, i32) {
    %c0_i32 = arith.constant 0 : i32
    %c0_i32_0 = arith.constant 0 : i32
    %c0_i32_1 = arith.constant 0 : i32
    return %c0_i32, %c0_i32_0 : i32, i32
  }
  func.func @transform_14(%arg0: i32) -> (i32, i32) {
    %c0_i32 = arith.constant 0 : i32
    %c0_i32_0 = arith.constant 0 : i32
    %c0_i32_1 = arith.constant 0 : i32
    return %c0_i32, %c0_i32_0 : i32, i32
  }
  func.func @transform_15(%arg0: i32) -> (i32, i32) {
    %c0_i32 = arith.constant 0 : i32
    %c0_i32_0 = arith.constant 0 : i32
    %c0_i32_1 = arith.constant 0 : i32
    return %c0_i32, %c0_i32_0 : i32, i32
  }
  func.func @transform_16(%arg0: i32) -> (i32, i32) {
    %c0_i32 = arith.constant 0 : i32
    %c0_i32_0 = arith.constant 0 : i32
    return %arg0, %c0_i32 : i32, i32
  }
}

module attributes {stable_mosaic.version = 11 : i64} {
  func.func @encoder_block_kernel(%arg0: i32, %arg1: memref<8x32xf32, #tpu.memory_space<vmem>>, %arg2: memref<16x32xf32, #tpu.memory_space<vmem>>, %arg3: memref<32x32xf32, #tpu.memory_space<vmem>>, %arg4: memref<1x32xf32, #tpu.memory_space<vmem>>, %arg5: memref<32x64xf32, #tpu.memory_space<vmem>>, %arg6: memref<1x64xf32, #tpu.memory_space<vmem>>, %arg7: memref<32x32xf32, #tpu.memory_space<vmem>>, %arg8: memref<1x32xf32, #tpu.memory_space<vmem>>, %arg9: memref<32x64xf32, #tpu.memory_space<vmem>>, %arg10: memref<1x64xf32, #tpu.memory_space<vmem>>, %arg11: memref<64x32xf32, #tpu.memory_space<vmem>>, %arg12: memref<1x32xf32, #tpu.memory_space<vmem>>, %arg13: memref<1x32xf32, #tpu.memory_space<vmem>>, %arg14: memref<1x32xf32, #tpu.memory_space<vmem>>, %arg15: memref<1x32xf32, #tpu.memory_space<vmem>>, %arg16: memref<1x32xf32, #tpu.memory_space<vmem>>, %arg17: memref<8x32xf32, #tpu.memory_space<vmem>>, %arg18: memref<8x32xf32, #tpu.memory_space<vmem>>) attributes {dimension_semantics = [#tpu.dimension_semantics<parallel>], iteration_bounds = array<i64: 2>, scalar_prefetch = 0 : i64, scratch_operands = 1 : i64, tpu.core_type = #tpu.core_type<tc>, window_params = [{transform_indices = @transform_0, window_bounds = array<i64: 8, 32>}, {pipeline_mode = #tpu.pipeline_mode<synchronous>, transform_indices = @transform_1, window_bounds = array<i64: 16, 32>}, {pipeline_mode = #tpu.pipeline_mode<synchronous>, transform_indices = @transform_2, window_bounds = array<i64: 32, 32>}, {pipeline_mode = #tpu.pipeline_mode<synchronous>, transform_indices = @transform_3, window_bounds = array<i64: 1, 32>}, {pipeline_mode = #tpu.pipeline_mode<synchronous>, transform_indices = @transform_4, window_bounds = array<i64: 32, 64>}, {pipeline_mode = #tpu.pipeline_mode<synchronous>, transform_indices = @transform_5, window_bounds = array<i64: 1, 64>}, {pipeline_mode = #tpu.pipeline_mode<synchronous>, transform_indices = @transform_6, window_bounds = array<i64: 32, 32>}, {pipeline_mode = #tpu.pipeline_mode<synchronous>, transform_indices = @transform_7, window_bounds = array<i64: 1, 32>}, {pipeline_mode = #tpu.pipeline_mode<synchronous>, transform_indices = @transform_8, window_bounds = array<i64: 32, 64>}, {pipeline_mode = #tpu.pipeline_mode<synchronous>, transform_indices = @transform_9, window_bounds = array<i64: 1, 64>}, {pipeline_mode = #tpu.pipeline_mode<synchronous>, transform_indices = @transform_10, window_bounds = array<i64: 64, 32>}, {pipeline_mode = #tpu.pipeline_mode<synchronous>, transform_indices = @transform_11, window_bounds = array<i64: 1, 32>}, {pipeline_mode = #tpu.pipeline_mode<synchronous>, transform_indices = @transform_12, window_bounds = array<i64: 1, 32>}, {pipeline_mode = #tpu.pipeline_mode<synchronous>, transform_indices = @transform_13, window_bounds = array<i64: 1, 32>}, {pipeline_mode = #tpu.pipeline_mode<synchronous>, transform_indices = @transform_14, window_bounds = array<i64: 1, 32>}, {pipeline_mode = #tpu.pipeline_mode<synchronous>, transform_indices = @transform_15, window_bounds = array<i64: 1, 32>}, {transform_indices = @transform_16, window_bounds = array<i64: 8, 32>}]} {
    %c0 = arith.constant 0 : index
    %c0_0 = arith.constant 0 : index
    %0 = vector.load %arg1[%c0, %c0_0] : memref<8x32xf32, #tpu.memory_space<vmem>>, vector<8x32xf32>
    %c0_1 = arith.constant 0 : index
    %c0_2 = arith.constant 0 : index
    %1 = vector.load %arg3[%c0_1, %c0_2] : memref<32x32xf32, #tpu.memory_space<vmem>>, vector<32x32xf32>
    %cst = arith.constant dense<0.000000e+00> : vector<8x32xf32>
    %2 = tpu.matmul %0, %1, %cst {dimension_numbers = #tpu.dot_dimension_numbers<[1], [0], [0], [1], [0, 0, 1, 1], [], []>} : vector<8x32xf32>, vector<32x32xf32>, vector<8x32xf32> -> vector<8x32xf32>
    %c0_3 = arith.constant 0 : index
    %c0_4 = arith.constant 0 : index
    %3 = vector.load %arg4[%c0_3, %c0_4] : memref<1x32xf32, #tpu.memory_space<vmem>>, vector<1x32xf32>
    %4 = vector.broadcast %3 : vector<1x32xf32> to vector<8x32xf32>
    %5 = arith.addf %2, %4 : vector<8x32xf32>
    %c0_5 = arith.constant 0 : index
    %c0_6 = arith.constant 0 : index
    %6 = vector.load %arg2[%c0_5, %c0_6] : memref<16x32xf32, #tpu.memory_space<vmem>>, vector<16x32xf32>
    %c0_7 = arith.constant 0 : index
    %c0_8 = arith.constant 0 : index
    %7 = vector.load %arg5[%c0_7, %c0_8] : memref<32x64xf32, #tpu.memory_space<vmem>>, vector<32x64xf32>
    %cst_9 = arith.constant dense<0.000000e+00> : vector<16x64xf32>
    %8 = tpu.matmul %6, %7, %cst_9 {dimension_numbers = #tpu.dot_dimension_numbers<[1], [0], [0], [1], [0, 0, 1, 1], [], []>} : vector<16x32xf32>, vector<32x64xf32>, vector<16x64xf32> -> vector<16x64xf32>
    %c0_10 = arith.constant 0 : index
    %c0_11 = arith.constant 0 : index
    %9 = vector.load %arg6[%c0_10, %c0_11] : memref<1x64xf32, #tpu.memory_space<vmem>>, vector<1x64xf32>
    %10 = vector.broadcast %9 : vector<1x64xf32> to vector<16x64xf32>
    %11 = arith.addf %8, %10 : vector<16x64xf32>
    %c8_i32 = arith.constant 8 : i32
    %12 = arith.muli %arg0, %c8_i32 : i32
    %13 = tpu.iota {dimensions = array<i32: 0>} : vector<8x16xi32>
    %14 = vector.broadcast %12 : i32 to vector<8x16xi32>
    %15 = arith.addi %14, %13 : vector<8x16xi32>
    %16 = tpu.iota {dimensions = array<i32: 1>} : vector<8x16xi32>
    %c2_i32 = arith.constant 2 : i32
    %c0_i32 = arith.constant 0 : i32
    %17 = arith.cmpi eq, %c2_i32, %c0_i32 : i32
    %c1_i32 = arith.constant 1 : i32
    %18 = arith.select %17, %c1_i32, %c2_i32 : i32
    %19 = vector.broadcast %18 : i32 to vector<8x16xi32>
    %20 = arith.remsi %15, %19 : vector<8x16xi32>
    %c0_i32_12 = arith.constant 0 : i32
    %21 = vector.broadcast %c0_i32_12 : i32 to vector<8x16xi32>
    %22 = arith.cmpi ne, %20, %21 : vector<8x16xi32>
    %c0_i32_13 = arith.constant 0 : i32
    %23 = vector.broadcast %c0_i32_13 : i32 to vector<8x16xi32>
    %24 = arith.cmpi slt, %20, %23 : vector<8x16xi32>
    %c0_i32_14 = arith.constant 0 : i32
    %25 = arith.cmpi slt, %18, %c0_i32_14 : i32
    %26 = vector.broadcast %25 : i1 to vector<8x16xi1>
    %27 = vector.broadcast %26 : vector<8x16xi1> to vector<8x16xi1>
    %28 = arith.xori %24, %27 : vector<8x16xi1>
    %29 = arith.andi %28, %22 : vector<8x16xi1>
    %30 = vector.broadcast %18 : i32 to vector<8x16xi32>
    %31 = arith.addi %20, %30 : vector<8x16xi32>
    %32 = arith.select %29, %31, %20 : vector<8x16xi1>, vector<8x16xi32>
    %c2_i32_15 = arith.constant 2 : i32
    %c0_i32_16 = arith.constant 0 : i32
    %33 = arith.cmpi eq, %c2_i32_15, %c0_i32_16 : i32
    %c1_i32_17 = arith.constant 1 : i32
    %34 = arith.select %33, %c1_i32_17, %c2_i32_15 : i32
    %35 = vector.broadcast %34 : i32 to vector<8x16xi32>
    %36 = arith.remsi %16, %35 : vector<8x16xi32>
    %c0_i32_18 = arith.constant 0 : i32
    %37 = vector.broadcast %c0_i32_18 : i32 to vector<8x16xi32>
    %38 = arith.cmpi ne, %36, %37 : vector<8x16xi32>
    %c0_i32_19 = arith.constant 0 : i32
    %39 = vector.broadcast %c0_i32_19 : i32 to vector<8x16xi32>
    %40 = arith.cmpi slt, %36, %39 : vector<8x16xi32>
    %c0_i32_20 = arith.constant 0 : i32
    %41 = arith.cmpi slt, %34, %c0_i32_20 : i32
    %42 = vector.broadcast %41 : i1 to vector<8x16xi1>
    %43 = vector.broadcast %42 : vector<8x16xi1> to vector<8x16xi1>
    %44 = arith.xori %40, %43 : vector<8x16xi1>
    %45 = arith.andi %44, %38 : vector<8x16xi1>
    %46 = vector.broadcast %34 : i32 to vector<8x16xi32>
    %47 = arith.addi %36, %46 : vector<8x16xi32>
    %48 = arith.select %45, %47, %36 : vector<8x16xi1>, vector<8x16xi32>
    %49 = arith.cmpi eq, %32, %48 : vector<8x16xi32>
    %50 = vector.extract_strided_slice %5 {offsets = [0, 0], sizes = [8, 8], strides = [1, 1]} : vector<8x32xf32> to vector<8x8xf32>
    %51 = vector.extract_strided_slice %11 {offsets = [0, 0], sizes = [16, 8], strides = [1, 1]} : vector<16x64xf32> to vector<16x8xf32>
    %52 = vector.extract_strided_slice %11 {offsets = [0, 32], sizes = [16, 8], strides = [1, 1]} : vector<16x64xf32> to vector<16x8xf32>
    "tpu.trace_start"() <{level = 10 : i32, message = "qd,kd->qk"}> : () -> ()
    %cst_21 = arith.constant dense<0.000000e+00> : vector<8x16xf32>
    %53 = tpu.matmul %50, %51, %cst_21 {dimension_numbers = #tpu.dot_dimension_numbers<[1], [1], [0], [0], [0, 0, 1, 0], [], []>} : vector<8x8xf32>, vector<16x8xf32>, vector<8x16xf32> -> vector<8x16xf32>
    %cst_22 = arith.constant -1.000000e+30 : f32
    "tpu.trace_stop"() : () -> ()
    %54 = vector.broadcast %cst_22 : f32 to vector<8x16xf32>
    %55 = arith.select %49, %53, %54 : vector<8x16xi1>, vector<8x16xf32>
    %cst_23 = arith.constant dense<0xFF800000> : vector<8xf32>
    %56 = vector.multi_reduction <maximumf>, %55, %cst_23 [1] : vector<8x16xf32> to vector<8xf32>
    %57 = vector.shape_cast %56 : vector<8xf32> to vector<8x1xf32>
    %58 = vector.broadcast %57 : vector<8x1xf32> to vector<8x16xf32>
    %59 = arith.subf %55, %58 : vector<8x16xf32>
    %60 = math.exp %59 : vector<8x16xf32>
    %cst_24 = arith.constant dense<0.000000e+00> : vector<8xf32>
    %61 = vector.multi_reduction <add>, %60, %cst_24 [1] : vector<8x16xf32> to vector<8xf32>
    %62 = vector.shape_cast %61 : vector<8xf32> to vector<8x1xf32>
    %63 = vector.broadcast %62 : vector<8x1xf32> to vector<8x16xf32>
    %64 = arith.divf %60, %63 : vector<8x16xf32>
    %cst_25 = arith.constant dense<0.000000e+00> : vector<8x8xf32>
    %65 = tpu.matmul %64, %52, %cst_25 {dimension_numbers = #tpu.dot_dimension_numbers<[1], [0], [0], [1], [0, 0, 1, 1], [], []>} : vector<8x16xf32>, vector<16x8xf32>, vector<8x8xf32> -> vector<8x8xf32>
    %c0_26 = arith.constant 0 : index
    %c0_27 = arith.constant 0 : index
    %66 = vector.load %arg18[%c0_26, %c0_27] : memref<8x32xf32, #tpu.memory_space<vmem>>, vector<8x8xf32>
    tpu.vector_store %arg18[%c0_26, %c0_27], %65 {strides = array<i32>} : memref<8x32xf32, #tpu.memory_space<vmem>>, vector<8x8xf32>,
    %67 = vector.extract_strided_slice %5 {offsets = [0, 8], sizes = [8, 8], strides = [1, 1]} : vector<8x32xf32> to vector<8x8xf32>
    %68 = vector.extract_strided_slice %11 {offsets = [0, 8], sizes = [16, 8], strides = [1, 1]} : vector<16x64xf32> to vector<16x8xf32>
    %69 = vector.extract_strided_slice %11 {offsets = [0, 40], sizes = [16, 8], strides = [1, 1]} : vector<16x64xf32> to vector<16x8xf32>
    "tpu.trace_start"() <{level = 10 : i32, message = "qd,kd->qk"}> : () -> ()
    %cst_28 = arith.constant dense<0.000000e+00> : vector<8x16xf32>
    %70 = tpu.matmul %67, %68, %cst_28 {dimension_numbers = #tpu.dot_dimension_numbers<[1], [1], [0], [0], [0, 0, 1, 0], [], []>} : vector<8x8xf32>, vector<16x8xf32>, vector<8x16xf32> -> vector<8x16xf32>
    %cst_29 = arith.constant -1.000000e+30 : f32
    "tpu.trace_stop"() : () -> ()
    %71 = vector.broadcast %cst_29 : f32 to vector<8x16xf32>
    %72 = arith.select %49, %70, %71 : vector<8x16xi1>, vector<8x16xf32>
    %cst_30 = arith.constant dense<0xFF800000> : vector<8xf32>
    %73 = vector.multi_reduction <maximumf>, %72, %cst_30 [1] : vector<8x16xf32> to vector<8xf32>
    %74 = vector.shape_cast %73 : vector<8xf32> to vector<8x1xf32>
    %75 = vector.broadcast %74 : vector<8x1xf32> to vector<8x16xf32>
    %76 = arith.subf %72, %75 : vector<8x16xf32>
    %77 = math.exp %76 : vector<8x16xf32>
    %cst_31 = arith.constant dense<0.000000e+00> : vector<8xf32>
    %78 = vector.multi_reduction <add>, %77, %cst_31 [1] : vector<8x16xf32> to vector<8xf32>
    %79 = vector.shape_cast %78 : vector<8xf32> to vector<8x1xf32>
    %80 = vector.broadcast %79 : vector<8x1xf32> to vector<8x16xf32>
    %81 = arith.divf %77, %80 : vector<8x16xf32>
    %cst_32 = arith.constant dense<0.000000e+00> : vector<8x8xf32>
    %82 = tpu.matmul %81, %69, %cst_32 {dimension_numbers = #tpu.dot_dimension_numbers<[1], [0], [0], [1], [0, 0, 1, 1], [], []>} : vector<8x16xf32>, vector<16x8xf32>, vector<8x8xf32> -> vector<8x8xf32>
    %c0_33 = arith.constant 0 : index
    %c8 = arith.constant 8 : index
    %83 = vector.load %arg18[%c0_33, %c8] : memref<8x32xf32, #tpu.memory_space<vmem>>, vector<8x8xf32>
    tpu.vector_store %arg18[%c0_33, %c8], %82 {strides = array<i32>} : memref<8x32xf32, #tpu.memory_space<vmem>>, vector<8x8xf32>,
    %84 = vector.extract_strided_slice %5 {offsets = [0, 16], sizes = [8, 8], strides = [1, 1]} : vector<8x32xf32> to vector<8x8xf32>
    %85 = vector.extract_strided_slice %11 {offsets = [0, 16], sizes = [16, 8], strides = [1, 1]} : vector<16x64xf32> to vector<16x8xf32>
    %86 = vector.extract_strided_slice %11 {offsets = [0, 48], sizes = [16, 8], strides = [1, 1]} : vector<16x64xf32> to vector<16x8xf32>
    "tpu.trace_start"() <{level = 10 : i32, message = "qd,kd->qk"}> : () -> ()
    %cst_34 = arith.constant dense<0.000000e+00> : vector<8x16xf32>
    %87 = tpu.matmul %84, %85, %cst_34 {dimension_numbers = #tpu.dot_dimension_numbers<[1], [1], [0], [0], [0, 0, 1, 0], [], []>} : vector<8x8xf32>, vector<16x8xf32>, vector<8x16xf32> -> vector<8x16xf32>
    %cst_35 = arith.constant -1.000000e+30 : f32
    "tpu.trace_stop"() : () -> ()
    %88 = vector.broadcast %cst_35 : f32 to vector<8x16xf32>
    %89 = arith.select %49, %87, %88 : vector<8x16xi1>, vector<8x16xf32>
    %cst_36 = arith.constant dense<0xFF800000> : vector<8xf32>
    %90 = vector.multi_reduction <maximumf>, %89, %cst_36 [1] : vector<8x16xf32> to vector<8xf32>
    %91 = vector.shape_cast %90 : vector<8xf32> to vector<8x1xf32>
    %92 = vector.broadcast %91 : vector<8x1xf32> to vector<8x16xf32>
    %93 = arith.subf %89, %92 : vector<8x16xf32>
    %94 = math.exp %93 : vector<8x16xf32>
    %cst_37 = arith.constant dense<0.000000e+00> : vector<8xf32>
    %95 = vector.multi_reduction <add>, %94, %cst_37 [1] : vector<8x16xf32> to vector<8xf32>
    %96 = vector.shape_cast %95 : vector<8xf32> to vector<8x1xf32>
    %97 = vector.broadcast %96 : vector<8x1xf32> to vector<8x16xf32>
    %98 = arith.divf %94, %97 : vector<8x16xf32>
    %cst_38 = arith.constant dense<0.000000e+00> : vector<8x8xf32>
    %99 = tpu.matmul %98, %86, %cst_38 {dimension_numbers = #tpu.dot_dimension_numbers<[1], [0], [0], [1], [0, 0, 1, 1], [], []>} : vector<8x16xf32>, vector<16x8xf32>, vector<8x8xf32> -> vector<8x8xf32>
    %c0_39 = arith.constant 0 : index
    %c16 = arith.constant 16 : index
    %100 = vector.load %arg18[%c0_39, %c16] : memref<8x32xf32, #tpu.memory_space<vmem>>, vector<8x8xf32>
    tpu.vector_store %arg18[%c0_39, %c16], %99 {strides = array<i32>} : memref<8x32xf32, #tpu.memory_space<vmem>>, vector<8x8xf32>,
    %101 = vector.extract_strided_slice %5 {offsets = [0, 24], sizes = [8, 8], strides = [1, 1]} : vector<8x32xf32> to vector<8x8xf32>
    %102 = vector.extract_strided_slice %11 {offsets = [0, 24], sizes = [16, 8], strides = [1, 1]} : vector<16x64xf32> to vector<16x8xf32>
    %103 = vector.extract_strided_slice %11 {offsets = [0, 56], sizes = [16, 8], strides = [1, 1]} : vector<16x64xf32> to vector<16x8xf32>
    "tpu.trace_start"() <{level = 10 : i32, message = "qd,kd->qk"}> : () -> ()
    %cst_40 = arith.constant dense<0.000000e+00> : vector<8x16xf32>
    %104 = tpu.matmul %101, %102, %cst_40 {dimension_numbers = #tpu.dot_dimension_numbers<[1], [1], [0], [0], [0, 0, 1, 0], [], []>} : vector<8x8xf32>, vector<16x8xf32>, vector<8x16xf32> -> vector<8x16xf32>
    %cst_41 = arith.constant -1.000000e+30 : f32
    "tpu.trace_stop"() : () -> ()
    %105 = vector.broadcast %cst_41 : f32 to vector<8x16xf32>
    %106 = arith.select %49, %104, %105 : vector<8x16xi1>, vector<8x16xf32>
    %cst_42 = arith.constant dense<0xFF800000> : vector<8xf32>
    %107 = vector.multi_reduction <maximumf>, %106, %cst_42 [1] : vector<8x16xf32> to vector<8xf32>
    %108 = vector.shape_cast %107 : vector<8xf32> to vector<8x1xf32>
    %109 = vector.broadcast %108 : vector<8x1xf32> to vector<8x16xf32>
    %110 = arith.subf %106, %109 : vector<8x16xf32>
    %111 = math.exp %110 : vector<8x16xf32>
    %cst_43 = arith.constant dense<0.000000e+00> : vector<8xf32>
    %112 = vector.multi_reduction <add>, %111, %cst_43 [1] : vector<8x16xf32> to vector<8xf32>
    %113 = vector.shape_cast %112 : vector<8xf32> to vector<8x1xf32>
    %114 = vector.broadcast %113 : vector<8x1xf32> to vector<8x16xf32>
    %115 = arith.divf %111, %114 : vector<8x16xf32>
    %cst_44 = arith.constant dense<0.000000e+00> : vector<8x8xf32>
    %116 = tpu.matmul %115, %103, %cst_44 {dimension_numbers = #tpu.dot_dimension_numbers<[1], [0], [0], [1], [0, 0, 1, 1], [], []>} : vector<8x16xf32>, vector<16x8xf32>, vector<8x8xf32> -> vector<8x8xf32>
    %c0_45 = arith.constant 0 : index
    %c24 = arith.constant 24 : index
    %117 = vector.load %arg18[%c0_45, %c24] : memref<8x32xf32, #tpu.memory_space<vmem>>, vector<8x8xf32>
    tpu.vector_store %arg18[%c0_45, %c24], %116 {strides = array<i32>} : memref<8x32xf32, #tpu.memory_space<vmem>>, vector<8x8xf32>,
    %c0_46 = arith.constant 0 : index
    %c0_47 = arith.constant 0 : index
    %118 = vector.load %arg18[%c0_46, %c0_47] : memref<8x32xf32, #tpu.memory_space<vmem>>, vector<8x32xf32>
    %c0_48 = arith.constant 0 : index
    %c0_49 = arith.constant 0 : index
    %119 = vector.load %arg7[%c0_48, %c0_49] : memref<32x32xf32, #tpu.memory_space<vmem>>, vector<32x32xf32>
    %cst_50 = arith.constant dense<0.000000e+00> : vector<8x32xf32>
    %120 = tpu.matmul %118, %119, %cst_50 {dimension_numbers = #tpu.dot_dimension_numbers<[1], [0], [0], [1], [0, 0, 1, 1], [], []>} : vector<8x32xf32>, vector<32x32xf32>, vector<8x32xf32> -> vector<8x32xf32>
    %c0_51 = arith.constant 0 : index
    %c0_52 = arith.constant 0 : index
    %121 = vector.load %arg8[%c0_51, %c0_52] : memref<1x32xf32, #tpu.memory_space<vmem>>, vector<1x32xf32>
    %122 = vector.broadcast %121 : vector<1x32xf32> to vector<8x32xf32>
    %123 = arith.addf %120, %122 : vector<8x32xf32>
    %124 = arith.addf %0, %123 : vector<8x32xf32>
    %c0_53 = arith.constant 0 : index
    %c0_54 = arith.constant 0 : index
    %125 = vector.load %arg13[%c0_53, %c0_54] : memref<1x32xf32, #tpu.memory_space<vmem>>, vector<1x32xf32>
    %c0_55 = arith.constant 0 : index
    %c0_56 = arith.constant 0 : index
    %126 = vector.load %arg14[%c0_55, %c0_56] : memref<1x32xf32, #tpu.memory_space<vmem>>, vector<1x32xf32>
    %cst_57 = arith.constant dense<0.000000e+00> : vector<8xf32>
    %127 = vector.multi_reduction <add>, %124, %cst_57 [1] : vector<8x32xf32> to vector<8xf32>
    %128 = vector.shape_cast %127 : vector<8xf32> to vector<8x1xf32>
    %cst_58 = arith.constant 3.200000e+01 : f32
    %129 = vector.broadcast %cst_58 : f32 to vector<8x1xf32>
    %130 = arith.divf %128, %129 : vector<8x1xf32>
    %131 = vector.broadcast %130 : vector<8x1xf32> to vector<8x32xf32>
    %132 = arith.subf %124, %131 : vector<8x32xf32>
    %133 = arith.mulf %132, %132 : vector<8x32xf32>
    %cst_59 = arith.constant dense<0.000000e+00> : vector<8xf32>
    %134 = vector.multi_reduction <add>, %133, %cst_59 [1] : vector<8x32xf32> to vector<8xf32>
    %135 = vector.shape_cast %134 : vector<8xf32> to vector<8x1xf32>
    %cst_60 = arith.constant 3.200000e+01 : f32
    %136 = vector.broadcast %cst_60 : f32 to vector<8x1xf32>
    %137 = arith.divf %135, %136 : vector<8x1xf32>
    %138 = vector.broadcast %130 : vector<8x1xf32> to vector<8x32xf32>
    %139 = arith.subf %124, %138 : vector<8x32xf32>
    %cst_61 = arith.constant 9.99999974E-6 : f32
    %140 = vector.broadcast %cst_61 : f32 to vector<8x1xf32>
    %141 = arith.addf %137, %140 : vector<8x1xf32>
    %142 = math.rsqrt %141 : vector<8x1xf32>
    %143 = vector.broadcast %142 : vector<8x1xf32> to vector<8x32xf32>
    %144 = arith.mulf %139, %143 : vector<8x32xf32>
    %145 = vector.broadcast %125 : vector<1x32xf32> to vector<8x32xf32>
    %146 = arith.mulf %144, %145 : vector<8x32xf32>
    %147 = vector.broadcast %126 : vector<1x32xf32> to vector<8x32xf32>
    %148 = arith.addf %146, %147 : vector<8x32xf32>
    %c0_62 = arith.constant 0 : index
    %c0_63 = arith.constant 0 : index
    %149 = vector.load %arg9[%c0_62, %c0_63] : memref<32x64xf32, #tpu.memory_space<vmem>>, vector<32x64xf32>
    %cst_64 = arith.constant dense<0.000000e+00> : vector<8x64xf32>
    %150 = tpu.matmul %148, %149, %cst_64 {dimension_numbers = #tpu.dot_dimension_numbers<[1], [0], [0], [1], [0, 0, 1, 1], [], []>} : vector<8x32xf32>, vector<32x64xf32>, vector<8x64xf32> -> vector<8x64xf32>
    %c0_65 = arith.constant 0 : index
    %c0_66 = arith.constant 0 : index
    %151 = vector.load %arg10[%c0_65, %c0_66] : memref<1x64xf32, #tpu.memory_space<vmem>>, vector<1x64xf32>
    %152 = vector.broadcast %151 : vector<1x64xf32> to vector<8x64xf32>
    %153 = arith.addf %150, %152 : vector<8x64xf32>
    %cst_67 = arith.constant 0.000000e+00 : f32
    %154 = vector.broadcast %cst_67 : f32 to vector<8x64xf32>
    %155 = arith.maximumf %153, %154 : vector<8x64xf32>
    %c0_68 = arith.constant 0 : index
    %c0_69 = arith.constant 0 : index
    %156 = vector.load %arg11[%c0_68, %c0_69] : memref<64x32xf32, #tpu.memory_space<vmem>>, vector<64x32xf32>
    %cst_70 = arith.constant dense<0.000000e+00> : vector<8x32xf32>
    %157 = tpu.matmul %155, %156, %cst_70 {dimension_numbers = #tpu.dot_dimension_numbers<[1], [0], [0], [1], [0, 0, 1, 1], [], []>} : vector<8x64xf32>, vector<64x32xf32>, vector<8x32xf32> -> vector<8x32xf32>
    %c0_71 = arith.constant 0 : index
    %c0_72 = arith.constant 0 : index
    %158 = vector.load %arg12[%c0_71, %c0_72] : memref<1x32xf32, #tpu.memory_space<vmem>>, vector<1x32xf32>
    %159 = vector.broadcast %158 : vector<1x32xf32> to vector<8x32xf32>
    %160 = arith.addf %157, %159 : vector<8x32xf32>
    %161 = arith.addf %148, %160 : vector<8x32xf32>
    %c0_73 = arith.constant 0 : index
    %c0_74 = arith.constant 0 : index
    %162 = vector.load %arg15[%c0_73, %c0_74] : memref<1x32xf32, #tpu.memory_space<vmem>>, vector<1x32xf32>
    %c0_75 = arith.constant 0 : index
    %c0_76 = arith.constant 0 : index
    %163 = vector.load %arg16[%c0_75, %c0_76] : memref<1x32xf32, #tpu.memory_space<vmem>>, vector<1x32xf32>
    %cst_77 = arith.constant dense<0.000000e+00> : vector<8xf32>
    %164 = vector.multi_reduction <add>, %161, %cst_77 [1] : vector<8x32xf32> to vector<8xf32>
    %165 = vector.shape_cast %164 : vector<8xf32> to vector<8x1xf32>
    %cst_78 = arith.constant 3.200000e+01 : f32
    %166 = vector.broadcast %cst_78 : f32 to vector<8x1xf32>
    %167 = arith.divf %165, %166 : vector<8x1xf32>
    %168 = vector.broadcast %167 : vector<8x1xf32> to vector<8x32xf32>
    %169 = arith.subf %161, %168 : vector<8x32xf32>
    %170 = arith.mulf %169, %169 : vector<8x32xf32>
    %cst_79 = arith.constant dense<0.000000e+00> : vector<8xf32>
    %171 = vector.multi_reduction <add>, %170, %cst_79 [1] : vector<8x32xf32> to vector<8xf32>
    %172 = vector.shape_cast %171 : vector<8xf32> to vector<8x1xf32>
    %cst_80 = arith.constant 3.200000e+01 : f32
    %173 = vector.broadcast %cst_80 : f32 to vector<8x1xf32>
    %174 = arith.divf %172, %173 : vector<8x1xf32>
    %175 = vector.broadcast %167 : vector<8x1xf32> to vector<8x32xf32>
    %176 = arith.subf %161, %175 : vector<8x32xf32>
    %cst_81 = arith.constant 9.99999974E-6 : f32
    %177 = vector.broadcast %cst_81 : f32 to vector<8x1xf32>
    %178 = arith.addf %174, %177 : vector<8x1xf32>
    %179 = math.rsqrt %178 : vector<8x1xf32>
    %180 = vector.broadcast %179 : vector<8x1xf32> to vector<8x32xf32>
    %181 = arith.mulf %176, %180 : vector<8x32xf32>
    %182 = vector.broadcast %162 : vector<1x32xf32> to vector<8x32xf32>
    %183 = arith.mulf %181, %182 : vector<8x32xf32>
    %184 = vector.broadcast %163 : vector<1x32xf32> to vector<8x32xf32>
    %185 = arith.addf %183, %184 : vector<8x32xf32>
    %c0_82 = arith.constant 0 : index
    %c0_83 = arith.constant 0 : index
    %186 = vector.load %arg17[%c0_82, %c0_83] : memref<8x32xf32, #tpu.memory_space<vmem>>, vector<8x32xf32>
    tpu.vector_store %arg17[%c0_82, %c0_83], %185 {strides = array<i32>} : memref<8x32xf32, #tpu.memory_space<vmem>>, vector<8x32xf32>,
    return
  }
  func.func @transform_0(%arg0: i32) -> (i32, i32) {
    %c0_i32 = arith.constant 0 : i32
    %c0_i32_0 = arith.constant 0 : i32
    return %arg0, %c0_i32 : i32, i32
  }
  func.func @transform_1(%arg0: i32) -> (i32, i32) {
    %c0_i32 = arith.constant 0 : i32
    %c0_i32_0 = arith.constant 0 : i32
    %c0_i32_1 = arith.constant 0 : i32
    return %c0_i32, %c0_i32_0 : i32, i32
  }
  func.func @transform_2(%arg0: i32) -> (i32, i32) {
    %c0_i32 = arith.constant 0 : i32
    %c0_i32_0 = arith.constant 0 : i32
    %c0_i32_1 = arith.constant 0 : i32
    return %c0_i32, %c0_i32_0 : i32, i32
  }
  func.func @transform_3(%arg0: i32) -> (i32, i32) {
    %c0_i32 = arith.constant 0 : i32
    %c0_i32_0 = arith.constant 0 : i32
    %c0_i32_1 = arith.constant 0 : i32
    return %c0_i32, %c0_i32_0 : i32, i32
  }
  func.func @transform_4(%arg0: i32) -> (i32, i32) {
    %c0_i32 = arith.constant 0 : i32
    %c0_i32_0 = arith.constant 0 : i32
    %c0_i32_1 = arith.constant 0 : i32
    return %c0_i32, %c0_i32_0 : i32, i32
  }
  func.func @transform_5(%arg0: i32) -> (i32, i32) {
    %c0_i32 = arith.constant 0 : i32
    %c0_i32_0 = arith.constant 0 : i32
    %c0_i32_1 = arith.constant 0 : i32
    return %c0_i32, %c0_i32_0 : i32, i32
  }
  func.func @transform_6(%arg0: i32) -> (i32, i32) {
    %c0_i32 = arith.constant 0 : i32
    %c0_i32_0 = arith.constant 0 : i32
    %c0_i32_1 = arith.constant 0 : i32
    return %c0_i32, %c0_i32_0 : i32, i32
  }
  func.func @transform_7(%arg0: i32) -> (i32, i32) {
    %c0_i32 = arith.constant 0 : i32
    %c0_i32_0 = arith.constant 0 : i32
    %c0_i32_1 = arith.constant 0 : i32
    return %c0_i32, %c0_i32_0 : i32, i32
  }
  func.func @transform_8(%arg0: i32) -> (i32, i32) {
    %c0_i32 = arith.constant 0 : i32
    %c0_i32_0 = arith.constant 0 : i32
    %c0_i32_1 = arith.constant 0 : i32
    return %c0_i32, %c0_i32_0 : i32, i32
  }
  func.func @transform_9(%arg0: i32) -> (i32, i32) {
    %c0_i32 = arith.constant 0 : i32
    %c0_i32_0 = arith.constant 0 : i32
    %c0_i32_1 = arith.constant 0 : i32
    return %c0_i32, %c0_i32_0 : i32, i32
  }
  func.func @transform_10(%arg0: i32) -> (i32, i32) {
    %c0_i32 = arith.constant 0 : i32
    %c0_i32_0 = arith.constant 0 : i32
    %c0_i32_1 = arith.constant 0 : i32
    return %c0_i32, %c0_i32_0 : i32, i32
  }
  func.func @transform_11(%arg0: i32) -> (i32, i32) {
    %c0_i32 = arith.constant 0 : i32
    %c0_i32_0 = arith.constant 0 : i32
    %c0_i32_1 = arith.constant 0 : i32
    return %c0_i32, %c0_i32_0 : i32, i32
  }
  func.func @transform_12(%arg0: i32) -> (i32, i32) {
    %c0_i32 = arith.constant 0 : i32
    %c0_i32_0 = arith.constant 0 : i32
    %c0_i32_1 = arith.constant 0 : i32
    return %c0_i32, %c0_i32_0 : i32, i32
  }
  func.func @transform_13(%arg0: i32) -> (i32, i32) {
    %c0_i32 = arith.constant 0 : i32
    %c0_i32_0 = arith.constant 0 : i32
    %c0_i32_1 = arith.constant 0 : i32
    return %c0_i32, %c0_i32_0 : i32, i32
  }
  func.func @transform_14(%arg0: i32) -> (i32, i32) {
    %c0_i32 = arith.constant 0 : i32
    %c0_i32_0 = arith.constant 0 : i32
    %c0_i32_1 = arith.constant 0 : i32
    return %c0_i32, %c0_i32_0 : i32, i32
  }
  func.func @transform_15(%arg0: i32) -> (i32, i32) {
    %c0_i32 = arith.constant 0 : i32
    %c0_i32_0 = arith.constant 0 : i32
    %c0_i32_1 = arith.constant 0 : i32
    return %c0_i32, %c0_i32_0 : i32, i32
  }
  func.func @transform_16(%arg0: i32) -> (i32, i32) {
    %c0_i32 = arith.constant 0 : i32
    %c0_i32_0 = arith.constant 0 : i32
    return %arg0, %c0_i32 : i32, i32
  }
}

</mosaic_0001>

<bundles_post_ra>
// kernel: tpu_custom_call.1
= control target key start
LH: loop header
LB: loop body
LE: loop exit
PB: predicated region body
PF: predicated region fallthrough
CT: control target
= control target key end

     0   :  { %s3039_s0 = inlined_call_operand.hbm [shape: f32[16,32], index: 0, kind: input, shape index: {}]   ;;  %s3040_s1 = inlined_call_operand.hbm [shape: f32[16,32], index: 1, kind: input, shape index: {}]   ;;  %s3041_s2 = inlined_call_operand.vmem [shape: f32[32,32], index: 2, kind: input, shape index: {}]   ;;  %s3042_s3 = inlined_call_operand.vmem [shape: f32[1,32], index: 3, kind: input, shape index: {}]   ;;  %s3043_s4 = inlined_call_operand.vmem [shape: f32[32,64], index: 4, kind: input, shape index: {}]   ;;  %s3044_s5 = inlined_call_operand.vmem [shape: f32[1,64], index: 5, kind: input, shape index: {}]   ;;  %s3045_s6 = inlined_call_operand.vmem [shape: f32[32,32], index: 6, kind: input, shape index: {}]   ;;  %s3046_s7 = inlined_call_operand.vmem [shape: f32[1,32], index: 7, kind: input, shape index: {}]   ;;  %s3047_s8 = inlined_call_operand.hbm [shape: f32[32,64], index: 8, kind: input, shape index: {}]   ;;  %s3048_s9 = inlined_call_operand.vmem [shape: f32[1,64], index: 9, kind: input, shape index: {}]   ;;  %s3049_s10 = inlined_call_operand.vmem [shape: f32[64,32], index: 10, kind: input, shape index: {}]   ;;  %s3050_s11 = inlined_call_operand.vmem [shape: f32[1,32], index: 11, kind: input, shape index: {}]   ;;  %s3051_s12 = inlined_call_operand.vmem [shape: f32[1,32], index: 12, kind: input, shape index: {}]   ;;  %s3052_s13 = inlined_call_operand.vmem [shape: f32[1,32], index: 13, kind: input, shape index: {}]   ;;  %s3053_s14 = inlined_call_operand.vmem [shape: f32[1,32], index: 14, kind: input, shape index: {}]   ;;  %s3054_s15 = inlined_call_operand.vmem [shape: f32[1,32], index: 15, kind: input, shape index: {}]   ;;  %s3055_s16 = inlined_call_operand.hbm [shape: f32[16,32], index: 16, kind: output, shape index: {}]  }
   0x1   :  { %3064 = sst [smem:[#allocation15_spill]] %s3039_s0 }
   0x2   :  { %3065 = sst [smem:[#allocation16_spill]] %s3040_s1 }
   0x3   :  { %3066 = sst [smem:[#allocation17_spill]] %s3041_s2 }
   0x4   :  { %3067 = sst [smem:[#allocation18_spill]] %s3042_s3 }
   0x5   :  { %3068 = sst [smem:[#allocation19_spill]] %s3048_s9 }
   0x6   :  { %3069 = sst [smem:[#allocation20_spill]] %s3050_s11 }
   0x7   :  { %3070 = sst [smem:[#allocation21_spill]] %s3053_s14 }
   0x8   :  { %3071 = sst [smem:[#allocation22_spill]] %s3054_s15 }
   0x9   :  { %3072 = sst [smem:[#allocation23_spill]] %s3055_s16 }
   0xa   :  { %21 = vsyncpa [#allocation4], 0 }
   0xb   :  { %23 = vsyncpa [#allocation4 + $0x1], 0 }
   0xc   :  { %24 = vsyncpa [#allocation7], 0 }
   0xd   :  { %25 = vsyncpa [#allocation5], 0 }
   0xe   :  { %27 = vsyncpa [#allocation5 + $0x1], 0  ;;  %s2599_s21 = smov 0   ;;  %s2601_s22 = smov 0  }
   0xf   :  { %s2603_s23 = smov 0   ;;  %s2605_s24 = smov 0  }
  0x10 LB: > { %3073 = sst [smem:[#allocation13_spill]] %s2481_s21  ;;  %s2620_s25 = sadd.s32 4294967295, %s2493_s24   ;;  %s2493_s24 = sphi %s2605_s24, %s3107_s24   ;;  %s2489_s23 = sphi %s2603_s23, %s3106_s23   ;;  %s2485_s22 = sphi %s2601_s22, %s3105_s22   ;;  %s2481_s21 = sphi %s2599_s21, %s3104_s21  }
  0x11   : > { %s1912_s26 = sadd.s32 4294967294, %s2493_s24   ;;  %p53_p0 = scmp.ne.s32.totalorder %s2485_s22, %s2481_s21 }
  0x12   : > { %p3060_p1 = scmp.eq.s32.totalorder %s2620_s25, 0  ;;  %p398_p3 = scmp.eq.s32.totalorder %s1912_s26, 1 }
  0x13   : > { %p1913_p5 = scmp.ge.s32.totalorder %s2493_s24, 1  ;;  %p405_p7 = scmp.lt.s32.totalorder %s2493_s24, 3 }
  0x14   : > { %p2629_p4 = por %p3060_p1, %p53_p0  ;;  %p2634_p6 = por %p398_p3, %p53_p0 }
  0x15   : > { %p2639_p8 = pnand %p1913_p5, %p405_p7  ;;  %s2495_s30 = smov [#allocation6]  }
  0x16   : > { %s3074_s27 = scalar_select %p2629_p4, 1, 0 }
  0x17   : > { %s3075_s28 = scalar_select %p2634_p6, 1, 0 }
  0x18   : > { %s417_s0 = sshll.u32 %s2495_s30, 4  ;;  %p2212_p9 = pneg %p2639_p8  ;;  %s2643_s0 = int_to_ptr.vmem [resolvable:$true] %s417_s0 }
  0x19   : > { %3076 = sst [smem:[#allocation14_spill]] %s3075_s28  ;;  %s2496_s18 = smov [#allocation8]  }
  0x1a   : > { %p2650_p11 = pnand %p2212_p9, %p3060_p1  ;;  %s448_s19 = sshll.u32 %s2496_s18, 4  ;;  %s2654_s19 = int_to_ptr.vmem [resolvable:$true] %s448_s19 }
  0x1b   : > { %s3079_s1 = sld [smem:[#allocation16_spill]] }
  0x1c   : > { %p2339_p13 = pneg %p2650_p11 }
  0x21   : > { %s2337_s30 = scalar_lea.hbm %s3079_s1, 256 }
  0x22   : > { %p2338_p12 = scmp.ne.s32.totalorder %s3079_s1, %s2337_s30  ;;  %p2344_p5 = scmp.lt.u32.totalorder %s2337_s30, %s3079_s1 }
  0x24   : > { %p2340_p0 = pnand %p2339_p13, %p2338_p12 }
  0x26   : > { %p2341_p3 = pneg %p2340_p0 }
  0x28   : > { %p2346_p7 = pnand %p2344_p5, %p2341_p3 }
  0x2a   : > { %2349 = shalt.err (!%p2346_p7)
}
  0x2b   : > { %s2350_s18 = scalar_lea.vmem %s2643_s0, 256  ;;  %p2358_p2 = scmp.lt.s32.totalorder %s2643_s0, %s2643_s0 }
  0x2c   : > { %p2351_p9 = scmp.ne.s32.totalorder %s2643_s0, %s2350_s18  ;;  %p2359_p12 = scmp.lt.s32.totalorder %s2350_s18, %s2350_s18 }
  0x2e   : > { %p2353_p10 = pnand %p2351_p9, %p2339_p13  ;;  %p2360_p0 = por %p2359_p12, %p2358_p2 }
  0x30   : > { %p2354_p1 = pneg %p2353_p10 }
  0x32   : > { %p2361_p6 = pnand %p2360_p0, %p2354_p1 }
  0x34   : > { %2364 = shalt.err (!%p2361_p6)
}
  0x35   : > { %s2497_s15 = smov 128   ;;  %s2498_s16 = smov 8  }
  0x36   : > { %2215 = dma.hbm_to_vmem [thread:$0]  (!%p2650_p11), %s3079_s1, 256, %s2643_s0, [#allocation7], %s2497_s15, %s2497_s15, %s2498_s16  }
  0x37   : > { %s2365_s30 = scalar_lea.hbm %s3047_s8, 512 }
  0x38   : > { %p2366_p2 = scmp.ne.s32.totalorder %s3047_s8, %s2365_s30  ;;  %p2372_p10 = scmp.lt.u32.totalorder %s2365_s30, %s3047_s8 }
  0x3a   : > { %p2368_p1 = pnand %p2366_p2, %p2339_p13 }
  0x3c   : > { %p2369_p6 = pneg %p2368_p1 }
  0x3e   : > { %p2374_p3 = pnand %p2372_p10, %p2369_p6 }
  0x40   : > { %2377 = shalt.err (!%p2374_p3)
}
  0x41   : > { %s2378_s0 = scalar_lea.vmem %s2654_s19, 512  ;;  %p2386_p12 = scmp.lt.s32.totalorder %s2654_s19, %s2654_s19 }
  0x42   : > { %p2379_p5 = scmp.ne.s32.totalorder %s2654_s19, %s2378_s0  ;;  %p2387_p0 = scmp.lt.s32.totalorder %s2378_s0, %s2378_s0 }
  0x44   : > { %p2381_p7 = pnand %p2379_p5, %p2339_p13  ;;  %p2388_p2 = por %p2387_p0, %p2386_p12 }
  0x46   : > { %p2382_p9 = pneg %p2381_p7 }
  0x48   : > { %p2389_p1 = pnand %p2388_p2, %p2382_p9 }
  0x4a   : > { %2392 = shalt.err (!%p2389_p1)
}
  0x4b   : > { %2218 = dma.hbm_to_vmem [thread:$0]  (!%p2650_p11), %s3047_s8, 512, %s2654_s19, [#allocation7], %s2497_s15, %s2497_s15, %s2498_s16  }
  0x4c   : > { %s2709_s14 = sadd.s32 1, %s2493_s24   ;;  %s40_s17 = sadd.s32 1, %s2489_s23 }
  0x4d   : > { %s37_s21 = ssub.s32 %s2493_s24, %s2709_s14  ;;  %p47_p13 = scmp.ne.s32.totalorder %s2489_s23, %s2485_s22 }
  0x4e   : > { %p38_p6 = scmp.eq.s32.totalorder %s37_s21, 0  ;;  %p48_p10 = scmp.eq.s32.totalorder %s2493_s24, 0 }
  0x4f   : > { %p3080_p3 = scmp.eq.s32.totalorder %s2620_s25, 1  ;;  %p2229_p7 = scmp.lt.s32.totalorder %s2493_s24, 2 }
  0x50   : > { %s2725_s20 = scalar_select %p38_p6, %s2489_s23, %s40_s17  }
  0x51   : > { %p2719_p5 = por %p3080_p3, %p47_p13  ;;  %p49_p9 = por %p48_p10, %p47_p13 }
  0x52   : > { %s483_s26 = sand.u32 1, %s2489_s23   ;;  %s1918_s19 = sshll.u32 %s2493_s24, 7 }
  0x53   : > { %s3081_s28 = scalar_select %p2719_p5, 1, 0 }
  0x54   : > { %s1917_s30 = sshll.u32 %s483_s26, 3  ;;  %s3082_s18 = sld [smem:[#allocation15_spill]] }
  0x55   : > { %s487_s9 = scalar_lea.vmem [#allocation3], %s1917_s30  ;;  %p2736_p11 = pnand %p2229_p7, %p49_p9 }
  0x56   : > { %s494_s11 = sshll.u32 %s487_s9, 4  ;;  %s484_s21 = scalar_lea.sflag [#allocation4], %s483_s26  ;;  %s2734_s11 = int_to_ptr.vmem [resolvable:$true] %s494_s11 }
  0x57   : > { %p2395_p0 = pneg %p2736_p11 }
  0x5a   : > { %s2732_s0 = scalar_lea.hbm %s3082_s18, %s1918_s19  ;;  %s2398_s15 = scalar_lea.hbm %s3082_s18, 256 }
  0x5b   : > { %s2393_s1 = scalar_lea.hbm %s2732_s0, 128  ;;  %p2399_p13 = scmp.lt.u32.totalorder %s2732_s0, %s3082_s18 }
  0x5c   : > { %p2394_p12 = scmp.ne.s32.totalorder %s2732_s0, %s2393_s1  ;;  %p2400_p6 = scmp.lt.u32.totalorder %s2398_s15, %s2393_s1 }
  0x5d   : > { %p2402_p3 = scmp.lt.u32.totalorder %s2393_s1, %s2732_s0 }
  0x5e   : > { %p2396_p2 = pnand %p2395_p0, %p2394_p12  ;;  %p2401_p10 = por %p2400_p6, %p2399_p13 }
  0x60   : > { %p2397_p1 = pneg %p2396_p2  ;;  %p2403_p7 = por %p2402_p3, %p2401_p10 }
  0x62   : > { %p2404_p9 = pnand %p2403_p7, %p2397_p1 }
  0x64   : > { %2407 = shalt.err (!%p2404_p9)
}
  0x65   : > { %s2408_s26 = scalar_lea.vmem %s2734_s11, 128  ;;  %s2499_s19 = smov [#allocation3]  }
  0x66   : > { %p2409_p12 = scmp.ne.s32.totalorder %s2734_s11, %s2408_s26  ;;  %s2413_s30 = sshll.u32 %s2499_s19, 4  ;;  %s2414_s30 = int_to_ptr.vmem [resolvable:$false] %s2413_s30 }
  0x67   : > { %s2415_s16 = scalar_lea.vmem %s2414_s30, 256  ;;  %p2416_p4 = scmp.lt.s32.totalorder %s2734_s11, %s2414_s30 }
  0x68   : > { %p2411_p2 = pnand %p2409_p12, %p2395_p0  ;;  %p2417_p13 = scmp.lt.s32.totalorder %s2415_s16, %s2408_s26 }
  0x6a   : > { %p2412_p5 = pneg %p2411_p2  ;;  %p2418_p6 = por %p2417_p13, %p2416_p4 }
  0x6c   : > { %p2419_p10 = pnand %p2418_p6, %p2412_p5 }
  0x6e   : > { %2422 = shalt.err (!%p2419_p10)
}
  0x6f   : > { %2222 = dma.hbm_to_vmem [thread:$0]  (!%p2736_p11), %s2732_s0, 128, %s2734_s11, %s484_s21  }
  0x70   : > { %503 = sbr.rel (%p2639_p8) target bundleno = 4126 (0x101e), region = 84  ;;  %s2768_s1 = sand.u32 (!%p2639_p8), 1, %s2485_s22  }
  0x71   : > { %s3063_s15 = sshll.u32 (!%p2639_p8), %s2768_s1, 3  ;;  %s506_s9 = scalar_lea.sflag (!%p2639_p8), [#allocation4], %s2768_s1 }
  0x72   : > { %s509_s26 = scalar_lea.vmem (!%p2639_p8), [#allocation3], %s3063_s15  ;;  %p3084_p4 = scmp.ne.s32.totalorder (!%p2639_p8), %s3074_s27, 0 }
  0x77   : > { %2468 = dma.done.wait (%p3084_p4), %s506_s9, 128  }
  0x78   : > { %2470 = vsyncadd (%p3084_p4), %s506_s9, 4294967168  ;;  %p3085_p5 = scmp.eq.s32.totalorder %s2620_s25, 0 }
  0x7a   : > { %2472 = dma.done.wait (%p3085_p5), [#allocation7], 768   ;;  %p3086_p8 = pmov %p3085_p5 }
  0x7b   : > { %v2500_v0 = vmov 0.0|0.0   ;;  %vm2501_vm0 = vmmov 0   ;;  %v2502_v1 = vmov 0.0   ;;  %s3087_s2 = sld [smem:[#allocation17_spill]]  ;;  %v654_v7 = vld [vmem:[%s3043_s4] sm:$0xff]  ;;  %v655_v8 = vld [vmem:[%s3043_s4 + $0x8] sm:$0xff]  ;;  %v747_v33 = vlaneseq }
  0x7c   : > { %2474 = vsyncadd (%p3086_p8), [#allocation7], 4294966528  ;;  %2134 = vmatprep.subr.bf16.mxu1 %v2500_v0  ;;  %2023 = vmatprep.mubr.msk.f32.mxu1 %vm2501_vm0, %v2502_v1  ;;  %v2140_v10 = vpack.c.bf16 %v655_v8, %v654_v7  ;;  %v656_v11 = vld [vmem:[%s3043_s4 + $0x10] sm:$0xff]  ;;  %v657_v12 = vld [vmem:[%s3043_s4 + $0x18] sm:$0xff]  ;;  %vm578_vm1 = vcmask 261120   ;;  %vm778_vm2 = vcmask 64512  }
  0x7d   : > { %2148 = vmatprep.subr.bf16.mxu0 %v2500_v0  ;;  %2041 = vmatprep.mubr.msk.f32.mxu0 %vm2501_vm0, %v2502_v1  ;;  %v2813_v13 = vld [vmem:[%s509_s26] sm:$0xff]  ;;  %v2144_v14 = vpack.c.bf16 %v657_v12, %v656_v11  ;;  %v652_v15 = vld [vmem:[#allocation6] sm:$0xff]  ;;  %v653_v16 = vld [vmem:[#allocation6 + $0x8] sm:$0xff]  ;;  %s2503_s21 = smov 96   ;;  %s3090_s3 = sld [smem:[#allocation18_spill]]  ;;  %v748_v34 = vshrl.u32 %v747_v33, 7 }
  0x7e   : > { %v1926_v19 = vld [vmem:[%s3044_s5] ss:$0 sm:$0xff]  ;;  %vm2827_vm3 = vmpackc.low %vm778_vm2, %vm778_vm2  ;;  %s2504_s16 = smov 120   ;;  %s1929_s9 = sshll.u32 %s2620_s25, 3  ;;  %v752_v42 = vand.u32 127, %v747_v33  ;;  %vm859_vm9 = vcmask 130048  }
  0x7f   : > { %v749_v35 = vstv %s1929_s9  ;;  %s2505_s27 = smov 88   ;;  %s2506_s29 = smov 112   ;;  %vm1128_vm10 = vcmask 130112   ;;  %vm1307_vm11 = vcmask 195712   ;;  %vm1486_vm12 = vcmask 261312  }
  0x80   : > { %v750_v36 = vadd.s32 %v749_v35, %v748_v34  ;;  %v769_v44 = vand.u32 1, %v752_v42  ;;  %s2507_s0 = smov 80   ;;  %s2508_s11 = smov 104   ;;  %vm1704_vm13 = vcmask 523264  }
  0x81   : > { %v567_v2 = vld [vmem:[%s3087_s2] sm:$0xff]  ;;  %v568_v3 = vld [vmem:[%s3087_s2 + $0x8] sm:$0xff]  ;;  %v569_v4 = vld [vmem:[%s3087_s2 + $0x10] sm:$0xff]  ;;  %s2509_s17 = smov 72   ;;  %s2510_s15 = smov 16  }
  0x82   : > { %v2135_v5 = vpack.c.bf16 %v568_v3, %v567_v2  ;;  %v570_v6 = vld [vmem:[%s3087_s2 + $0x18] sm:$0xff]  ;;  %v754_v37 = vsub.s32 0, %v750_v36  ;;  %vm753_vm4 = vcmp.lt.s32.totalorder %v750_v36, 0  ;;  %s2511_s26 = smov 8   ;;  %s3098_s2 = sld [smem:[#allocation23_spill]] }
  0x83   : > { %v2138_v9 = vpack.c.bf16 %v570_v6, %v569_v4  ;;  %v1924_v27 = vld [vmem:[%s3090_s3] ss:$0 sm:$0xff]  ;;  %s1810_s19 = scalar_lea.sflag [#allocation5], %s2768_s1  ;;  %p3099_p0 = scmp.ne.s32.totalorder %s3081_s28, 0 }
  0x84   : > { %2136 = vmatpush3.bf16.msra.mxu1 %v2135_v5  ;;  %v1930_v38 = vmin.u32 %v754_v37, %v750_v36 }
  0x85   : > { %2137 = vmatprep.subr.bf16.mxu1 %v2500_v0 }
  0x86   : > { %v757_v39 = vand.u32 1, %v1930_v38 }
  0x88   : > { %2139 = vmatpush3.bf16.msra.mxu1 %v2138_v9  ;;  %v758_v40 = vsub.s32 0, %v757_v39 }
  0x89   : > { %2141 = vmatprep.subr.bf16.mxu1 %v2140_v10 }
  0x8a   : > { %v759_v41 = vsel %vm753_vm4, %v758_v40, %v757_v39 }
  0x8b   : > { %2024 = vmatmul.mubr.msk.f32.vlgmr.msra.gmra.mrb[0].mxu1 %vm578_vm1, %v2813_v13  ;;  %vm760_vm5 = vcmp.ne.s32.totalorder %v759_v41, 0  ;;  %vm761_vm6 = vcmp.lt.s32.totalorder %v759_v41, 0  ;;  %v763_v43 = vadd.s32 2, %v759_v41 }
  0x8c   : > { %2143 = vmatpush3.bf16.msra.mxu1 %v2140_v10  ;;  %2034 = vmatprep.mubr.msk.f32.mxu1 %vm578_vm1, %v652_v15  ;;  %vm762_vm7 = vmand %vm761_vm6, %vm760_vm5 }
  0x8d   : > { %2145 = vmatprep.subr.bf16.mxu1 %v2144_v14  ;;  %v764_v45 = vsel %vm762_vm7, %v763_v43, %v759_v41 }
  0x8e   : > { %vm2850_vm8 = vcmp.eq.s32.totalorder %v764_v45, %v769_v44 }
  0x90   : > { %2147 = vmatpush3.bf16.msra.mxu1 %v2144_v14 }
  0x91   : > { %2152 = vmatprep.subr.bf16.mxu1 %v2500_v0 }
  0x93   : > { %2035 = vmatmul.mubr.msk.f32.vlgmr.msra.gmra.mrb[2].mxu1 %vm578_vm1, %v653_v16 }
  0x94   : > { %2048 = vmatprep.mubr.msk.f32.mxu1 %vm2501_vm0, %v2502_v1 }
 0x15e   : > { %v648_v17 = vpop.f32.mrb[0].mxu1 }
 0x15f   : > { %v2025_v18 = vpop.f32.mrb[1].mxu1  ;;  %v2842_v28 = vadd.f32 %v1924_v27, %v648_v17 }
 0x166   : > { %v2036_v20 = vpop.f32.mrb[2].mxu1 }
 0x167   : > { %v743_v21 = vadd.f32 %v2036_v20, %v1926_v19  ;;  %v737_v22 = vpop.f32.mrb[3].mxu1 }
 0x168   : > { %v738_v23 = vadd.f32 %v1926_v19, %v737_v22 }
 0x16a   : > { %v2831_v25 = vpack.i.bf16 %v743_v21, %v738_v23  ;;  %v2149_v26 = vpack.c.bf16 %v743_v21, %v738_v23 }
 0x16c   : > { %2283 = vrot.lane.b32.xlu1 %v2831_v25, %s2503_s21  ;;  %2151 = vmatpush3.bf16.xpose.msk.msra.mxu0 %vm2827_vm3, %v2149_v26  ;;  %s3094_s21 = sld [smem:[#allocation20_spill]] }
 0x16d   : > { %2159 = vmatprep.subr.bf16.mxu0 %v2500_v0 }
 0x170   : > { %2288 = vrot.lane.b32.xlu1 %v2831_v25, %s2504_s16 }
 0x173   : > { %2042 = vmatmul.mubr.msk.f32.vlgmr.msra.gmra.mrb[0].mxu0 %vm778_vm2, %v2842_v28 }
 0x174   : > { %2062 = vmatprep.mubr.msk.f32.mxu0 %vm2501_vm0, %v2502_v1 }
 0x1de   : > { %v2284_v29 = vpop.permute.xlu1 %2283 }
 0x1df   : > { %v2286_v30 = vunpack.i.h.bf16 %v2284_v29  ;;  %v2285_v31 = vunpack.i.l.bf16 %v2284_v29 }
 0x1e1   : > { %v2153_v32 = vpack.c.bf16 %v2286_v30, %v2285_v31 }
 0x1e2   : > { %v2289_v57 = vpop.permute.xlu1 %2288 }
 0x1e3   : > { %2154 = vmatpush3.bf16.msra.mxu1 %v2153_v32  ;;  %v2291_v58 = vunpack.i.h.bf16 %v2289_v57  ;;  %v2290_v59 = vunpack.i.l.bf16 %v2289_v57 }
 0x1e4   : > { %2155 = vmatprep.subr.bf16.mxu1 %v2500_v0 }
 0x1e5   : > { %v2156_v62 = vpack.c.bf16 %v2291_v58, %v2290_v59 }
 0x246   : > { %v854_v47 = vpop.f32.mrb[0].mxu0 }
 0x247   : > { %v858_v48 = vsel %vm2850_vm8, %v854_v47, -1e+30  ;;  %v2043_v49 = vpop.f32.mrb[1].mxu0 }
 0x248   : > { %v860_v50 = vsel %vm859_vm9, %v858_v48, -inf }
 0x249   : > { %861 = vmax.xlane.f32.xlu0 %v860_v50 }
 0x2d6   : > { %v862_v51 = vpop.xlane.xlu0 %861 }
 0x2d7   : > { %v863_v52 = vsub.f32 %v858_v48, %v862_v51 }
 0x2d9   : > { %v864_v53 = vmul.f32 1.442695, %v863_v52 }
 0x2db   : > { %2317 = vpow2.f32 %v864_v53 }
 0x2e5   : > { %v2318_v54 = vpop.eup %2317 }
 0x2e6   : > { %v866_v55 = vsel %vm859_vm9, %v2318_v54, 0.0 }
 0x2e7   : > { %867 = vadd.xlane.f32.xlu0 %v866_v55 }
 0x2fd   : > { %951 = vrot.lane.b32.xlu0 %v2842_v28, %s2504_s16  ;;  %s3095_s16 = sld [smem:[#allocation21_spill]] }
 0x374   : > { %v868_v56 = vpop.xlane.xlu0 %867 }
 0x375   : > { %2319 = vrcp.f32 %v868_v56 }
 0x378   : > { %v952_v63 = vpop.permute.xlu0 %951 }
 0x37f   : > { %v2320_v60 = vpop.eup %2319 }
 0x380   : > { %v870_v61 = vmul.f32 %v2320_v60, %v2318_v54 }
 0x382   : > { %2049 = vmatmul.mubr.msk.f32.vlgmr.msra.gmra.mrb[4].mxu1 %vm859_vm9, %v870_v61 }
 0x383   : > { %2158 = vmatpush3.bf16.xpose.msk.msra.mxu1 %vm2827_vm3, %v2156_v62  ;;  %2055 = vmatprep.mubr.msk.f32.mxu1 %vm2501_vm0, %v2502_v1 }
 0x384   : > { %2166 = vmatprep.subr.bf16.mxu1 %v2500_v0 }
 0x38a   : > { %2056 = vmatmul.mubr.msk.f32.vlgmr.msra.gmra.mrb[6].mxu1 %vm778_vm2, %v952_v63 }
 0x38b   : > { %2076 = vmatprep.mubr.msk.f32.mxu1 %vm2501_vm0, %v2502_v1 }
 0x455   : > { %v946_v2 = vpop.f32.mrb[4].mxu1 }
 0x456   : > { %950 = vst.msk [vmem:[#allocation2] sm:$0xff] %vm778_vm2, %v946_v2  ;;  %v2050_v3 = vpop.f32.mrb[5].mxu1 }
 0x45d   : > { %v1029_v4 = vpop.f32.mrb[6].mxu1 }
 0x45e   : > { %v1033_v5 = vsel %vm2850_vm8, %v1029_v4, -1e+30  ;;  %v2057_v6 = vpop.f32.mrb[7].mxu1 }
 0x45f   : > { %v1034_v7 = vsel %vm859_vm9, %v1033_v5, -inf }
 0x460   : > { %1035 = vmax.xlane.f32.xlu1 %v1034_v7  ;;  %v1489_v7 = vld [vmem:[%s3045_s6] sm:$0xff] }
 0x471   : > { %2293 = vrot.lane.b32.xlu1 %v2831_v25, %s2505_s27 }
 0x475   : > { %1130 = vrot.lane.b32.xlu1 %v2842_v28, %s2506_s29 }
 0x4ed   : > { %v1036_v8 = vpop.xlane.xlu1 %1035 }
 0x4ee   : > { %v1037_v9 = vsub.f32 %v1033_v5, %v1036_v8  ;;  %v1490_v8 = vld [vmem:[%s3045_s6 + $0x8] sm:$0xff] }
 0x4f0   : > { %v1038_v10 = vmul.f32 1.442695, %v1037_v9  ;;  %v2177_v9 = vpack.c.bf16 %v1490_v8, %v1489_v7 }
 0x4f1   : > { %v2294_v11 = vpop.permute.xlu1 %2293 }
 0x4f2   : > { %2321 = vpow2.f32 %v1038_v10  ;;  %v2296_v12 = vunpack.i.h.bf16 %v2294_v11  ;;  %v2295_v14 = vunpack.i.l.bf16 %v2294_v11  ;;  %v1491_v10 = vld [vmem:[%s3045_s6 + $0x10] sm:$0xff]  ;;  %v1492_v11 = vld [vmem:[%s3045_s6 + $0x18] sm:$0xff] }
 0x4f4   : > { %v2160_v15 = vpack.c.bf16 %v2296_v12, %v2295_v14  ;;  %v2180_v12 = vpack.c.bf16 %v1492_v11, %v1491_v10  ;;  %v1955_v11 = vld [vmem:[%s3095_s16] ss:$0 sm:$0xff] }
 0x4f5   : > { %v1131_v27 = vpop.permute.xlu1 %1130 }
 0x4f6   : > { %2161 = vmatpush3.bf16.msra.mxu0 %v2160_v15 }
 0x4f7   : > { %2162 = vmatprep.subr.bf16.mxu0 %v2500_v0 }
 0x4fc   : > { %v2322_v16 = vpop.eup %2321 }
 0x4fd   : > { %v1040_v17 = vsel %vm859_vm9, %v2322_v16, 0.0 }
 0x4fe   : > { %1041 = vadd.xlane.f32.xlu0 %v1040_v17 }
 0x514   : > { %2298 = vrot.lane.b32.xlu0 %v2831_v25, %s2506_s29  ;;  %s3096_s29 = sld [smem:[#allocation22_spill]] }
 0x58b   : > { %v1042_v18 = vpop.xlane.xlu0 %1041 }
 0x58c   : > { %2323 = vrcp.f32 %v1042_v18  ;;  %v1947_v18 = vld [vmem:[%s3046_s7] ss:$0 sm:$0xff] }
 0x58f   : > { %v2299_v19 = vpop.permute.xlu0 %2298 }
 0x590   : > { %v2301_v20 = vunpack.i.h.bf16 %v2299_v19  ;;  %v2300_v21 = vunpack.i.l.bf16 %v2299_v19 }
 0x592   : > { %v2163_v26 = vpack.c.bf16 %v2301_v20, %v2300_v21 }
 0x596   : > { %v2324_v22 = vpop.eup %2323 }
 0x597   : > { %v1044_v23 = vmul.f32 %v2324_v22, %v2322_v16 }
 0x599   : > { %2063 = vmatmul.mubr.msk.f32.vlgmr.msra.gmra.mrb[2].mxu0 %vm859_vm9, %v1044_v23 }
 0x59a   : > { %2165 = vmatpush3.bf16.xpose.msk.msra.mxu0 %vm2827_vm3, %v2163_v26  ;;  %2069 = vmatprep.mubr.msk.f32.mxu0 %vm2501_vm0, %v2502_v1 }
 0x59b   : > { %2173 = vmatprep.subr.bf16.mxu0 %v2500_v0 }
 0x5a1   : > { %2070 = vmatmul.mubr.msk.f32.vlgmr.msra.gmra.mrb[4].mxu0 %vm778_vm2, %v1131_v27 }
 0x5a2   : > { %2090 = vmatprep.mubr.msk.f32.mxu0 %vm2501_vm0, %v2502_v1 }
 0x66c   : > { %v2887_v29 = vpop.f32.mrb[2].mxu0 }
 0x66d   : > { %v2064_v30 = vpop.f32.mrb[3].mxu0 }
 0x674   : > { %v1208_v31 = vpop.f32.mrb[4].mxu0 }
 0x675   : > { %v1212_v32 = vsel %vm2850_vm8, %v1208_v31, -1e+30  ;;  %v2071_v33 = vpop.f32.mrb[5].mxu0 }
 0x676   : > { %v1213_v34 = vsel %vm859_vm9, %v1212_v32, -inf }
 0x677   : > { %1214 = vmax.xlane.f32.xlu1 %v1213_v34  ;;  %v1606_v34 = vld [vmem:[#allocation8 + $0x10] sm:$0xff] }
 0x688   : > { %2303 = vrot.lane.b32.xlu1 %v2831_v25, %s2507_s0  ;;  %s1958_s0 = sshll.u32 %s2620_s25, 7  ;;  %s2513_s25 = smov [#allocation9]  }
 0x689   : > { %s2994_s3 = scalar_lea.hbm %s3098_s2, %s1958_s0  ;;  %s2427_s16 = sshll.u32 %s2513_s25, 4  ;;  %s2428_s16 = int_to_ptr.vmem [resolvable:$false] %s2427_s16 }
 0x68a   : > { %s2429_s9 = scalar_lea.vmem %s2428_s16, 256 }
 0x68c   : > { %1309 = vrot.lane.b32.xlu1 %v2842_v28, %s2508_s11 }
 0x704   : > { %v1215_v35 = vpop.xlane.xlu1 %1214 }
 0x705   : > { %v1216_v36 = vsub.f32 %v1212_v32, %v1215_v35  ;;  %v1605_v32 = vld [vmem:[#allocation8 + $0x8] sm:$0xff]  ;;  %v1607_v35 = vld [vmem:[#allocation8 + $0x18] sm:$0xff] }
 0x707   : > { %v1217_v37 = vmul.f32 1.442695, %v1216_v36  ;;  %v2186_v36 = vpack.c.bf16 %v1607_v35, %v1606_v34 }
 0x708   : > { %v2304_v38 = vpop.permute.xlu1 %2303 }
 0x709   : > { %2325 = vpow2.f32 %v1217_v37  ;;  %v2306_v39 = vunpack.i.h.bf16 %v2304_v38  ;;  %v2305_v40 = vunpack.i.l.bf16 %v2304_v38  ;;  %v1690_v37 = vld [vmem:[%s3049_s10 + $0x8] sm:$0xff]  ;;  %v1691_v38 = vld [vmem:[%s3049_s10 + $0x10] sm:$0xff] }
 0x70b   : > { %v2167_v41 = vpack.c.bf16 %v2306_v39, %v2305_v40  ;;  %v1692_v40 = vld [vmem:[%s3049_s10 + $0x18] sm:$0xff] }
 0x70c   : > { %v1310_v51 = vpop.permute.xlu1 %1309 }
 0x70d   : > { %2168 = vmatpush3.bf16.msra.mxu1 %v2167_v41  ;;  %v2192_v41 = vpack.c.bf16 %v1692_v40, %v1691_v38 }
 0x70e   : > { %2169 = vmatprep.subr.bf16.mxu1 %v2500_v0 }
 0x713   : > { %v2326_v42 = vpop.eup %2325 }
 0x714   : > { %v1219_v43 = vsel %vm859_vm9, %v2326_v42, 0.0 }
 0x715   : > { %1220 = vadd.xlane.f32.xlu0 %v1219_v43  ;;  %v1694_v43 = vld [vmem:[%s3049_s10 + $0x28] sm:$0xff] }
 0x72b   : > { %2308 = vrot.lane.b32.xlu0 %v2831_v25, %s2508_s11  ;;  %s2512_s11 = smov 24  }
 0x7a2   : > { %v1221_v44 = vpop.xlane.xlu0 %1220 }
 0x7a3   : > { %2327 = vrcp.f32 %v1221_v44 }
 0x7a6   : > { %v2309_v28 = vpop.permute.xlu0 %2308 }
 0x7a7   : > { %v2311_v45 = vunpack.i.h.bf16 %v2309_v28  ;;  %v2310_v47 = vunpack.i.l.bf16 %v2309_v28 }
 0x7a9   : > { %v2170_v50 = vpack.c.bf16 %v2311_v45, %v2310_v47 }
 0x7ad   : > { %v2328_v48 = vpop.eup %2327 }
 0x7ae   : > { %v1223_v49 = vmul.f32 %v2328_v48, %v2326_v42  ;;  %v1693_v42 = vld [vmem:[%s3049_s10 + $0x20] sm:$0xff] }
 0x7af   : > { %v2195_v44 = vpack.c.bf16 %v1694_v43, %v1693_v42 }
 0x7b0   : > { %2077 = vmatmul.mubr.msk.f32.vlgmr.msra.gmra.mrb[8].mxu1 %vm859_vm9, %v1223_v49  ;;  %v1949_v49 = vld [vmem:[%s3051_s12] ss:$0 sm:$0xff] }
 0x7b1   : > { %2172 = vmatpush3.bf16.xpose.msk.msra.mxu1 %vm2827_vm3, %v2170_v50  ;;  %2083 = vmatprep.mubr.msk.f32.mxu1 %vm2501_vm0, %v2502_v1 }
 0x7b2   : > { %2182 = vmatprep.subr.bf16.mxu1 %v2500_v0 }
 0x7b8   : > { %2084 = vmatmul.mubr.msk.f32.vlgmr.msra.gmra.mrb[10].mxu1 %vm778_vm2, %v1310_v51  ;;  %v1950_v51 = vld [vmem:[%s3052_s13] ss:$0 sm:$0xff] }
 0x7b9   : > { %2112 = vmatprep.mubr.msk.f32.mxu1 %vm2501_vm0, %v2502_v1 }
 0x883   : > { %v1299_v52 = vpop.f32.mrb[8].mxu1 }
 0x884   : > { %v2078_v53 = vpop.f32.mrb[9].mxu1 }
 0x88b   : > { %v1387_v54 = vpop.f32.mrb[10].mxu1 }
 0x88c   : > { %v1391_v55 = vsel %vm2850_vm8, %v1387_v54, -1e+30  ;;  %v2085_v56 = vpop.f32.mrb[11].mxu1  ;;  %v1696_v54 = vld [vmem:[%s3049_s10 + $0x38] sm:$0xff] }
 0x88d   : > { %v1392_v24 = vsel %vm859_vm9, %v1391_v55, -inf }
 0x88e   : > { %1393 = vmax.xlane.f32.xlu1 %v1392_v24 }
 0x89f   : > { %2313 = vrot.lane.b32.xlu1 %v2831_v25, %s2509_s17  ;;  %s3093_s17 = sld [smem:[#allocation19_spill]] }
 0x8a3   : > { %1304 = vrot.lane.b32.xlu1 %v1299_v52, %s2510_s15 }
 0x8a5   : > { %v1951_v56 = vld [vmem:[%s3093_s17] ss:$0 sm:$0xff] }
 0x91b   : > { %v1394_v57 = vpop.xlane.xlu1 %1393 }
 0x91c   : > { %v1395_v58 = vsub.f32 %v1391_v55, %v1394_v57 }
 0x91e   : > { %v1396_v59 = vmul.f32 1.442695, %v1395_v58 }
 0x91f   : > { %v2314_v60 = vpop.permute.xlu1 %2313 }
 0x920   : > { %2329 = vpow2.f32 %v1396_v59  ;;  %v2316_v61 = vunpack.i.h.bf16 %v2314_v60  ;;  %v2315_v62 = vunpack.i.l.bf16 %v2314_v60  ;;  %v1953_v60 = vld [vmem:[%s3094_s21] ss:$0 sm:$0xff] }
 0x922   : > { %v2174_v63 = vpack.c.bf16 %v2316_v61, %v2315_v62 }
 0x923   : > { %v1305_v4 = vpop.permute.xlu1 %1304 }
 0x924   : > { %2175 = vmatpush3.bf16.msra.mxu0 %v2174_v63 }
 0x925   : > { %2176 = vmatprep.subr.bf16.mxu0 %v2500_v0 }
 0x92a   : > { %v2330_v46 = vpop.eup %2329 }
 0x92b   : > { %v1398_v2 = vsel %vm859_vm9, %v2330_v46, 0.0 }
 0x92c   : > { %1399 = vadd.xlane.f32.xlu0 %v1398_v2 }
 0x942   : > { %1125 = vrot.lane.b32.xlu0 %v2887_v29, %s2511_s26 }
 0x9b9   : > { %v1400_v25 = vpop.xlane.xlu0 %1399 }
 0x9ba   : > { %2331 = vrcp.f32 %v1400_v25 }
 0x9bd   : > { %v1126_v3 = vpop.permute.xlu0 %1125 }
 0x9be   : > { %1129 = vst.msk [vmem:[#allocation2] sm:$0xff] %vm1128_vm10, %v1126_v3 }
 0x9bf   : > { %1308 = vst.msk [vmem:[#allocation2] sm:$0xff] %vm1307_vm11, %v1305_v4 }
 0x9c4   : > { %v2332_v5 = vpop.eup %2331 }
 0x9c5   : > { %v1402_v6 = vmul.f32 %v2332_v5, %v2330_v46 }
 0x9c7   : > { %2091 = vmatmul.mubr.msk.f32.vlgmr.msra.gmra.mrb[6].mxu0 %vm859_vm9, %v1402_v6 }
 0x9c8   : > { %2101 = vmatprep.mubr.msk.f32.mxu0 %vm2501_vm0, %v2502_v1  ;;  %2178 = vmatpush3.bf16.msra.mxu0 %v2177_v9 }
 0x9c9   : > { %2179 = vmatprep.subr.bf16.mxu0 %v2500_v0 }
 0x9cc   : > { %2181 = vmatpush3.bf16.msra.mxu0 %v2180_v12 }
 0x9cd   : > { %2188 = vmatprep.subr.bf16.mxu0 %v2500_v0 }
 0xa9a   : > { %v1478_v14 = vpop.f32.mrb[6].mxu0 }
 0xa9b   : > { %1483 = vrot.lane.b32.xlu1 %v1478_v14, %s2512_s11  ;;  %v2092_v15 = vpop.f32.mrb[7].mxu0  ;;  %v1956_v14 = vld [vmem:[%s3096_s29] ss:$0 sm:$0xff]  ;;  %s3097_s11 = sshll.u32 %s2768_s1, 3 }
 0xa9c   : > { %s565_s17 = scalar_lea.vmem [#allocation9], %s3097_s11 }
 0xa9d   : > { %s1823_s15 = sshll.u32 %s565_s17, 4  ;;  %s2996_s15 = int_to_ptr.vmem [resolvable:$true] %s1823_s15 }
 0xa9e   : > { %s2423_s30 = scalar_lea.vmem %s2996_s15, 128  ;;  %p2430_p7 = scmp.lt.s32.totalorder %s2996_s15, %s2428_s16 }
 0xa9f   : > { %p2424_p11 = scmp.ne.s32.totalorder %s2996_s15, %s2423_s30  ;;  %p2431_p9 = scmp.lt.s32.totalorder %s2429_s9, %s2423_s30 }
 0xaa1   : > { %p2425_p1 = pnand %p2424_p11, %p3099_p0  ;;  %p2432_p12 = por %p2431_p9, %p2430_p7 }
 0xaa3   : > { %p2426_p3 = pneg %p2425_p1 }
 0xaa5   : > { %p2433_p2 = pnand %p2432_p12, %p2426_p3 }
 0xb0d   : > { %v1484_v16 = vpop.permute.xlu1 %1483 }
 0xb0e   : > { %1487 = vst.msk [vmem:[#allocation2] sm:$0xff] %vm1486_vm12, %v1484_v16 }
 0xb15   : > { %v1488_v17 = vld [vmem:[#allocation2] sm:$0xff] }
 0xb16   : > { %2102 = vmatmul.mubr.msk.f32.vlgmr.msra.gmra.mrb[8].mxu0 %vm578_vm1, %v1488_v17 }
 0xb17   : > { %2131 = vmatprep.mubr.msk.f32.mxu0 %vm2501_vm0, %v2502_v1  ;;  %v1604_v1 = vld [vmem:[#allocation8] sm:$0xff] }
 0xb18   : > { %v2183_v33 = vpack.c.bf16 %v1605_v32, %v1604_v1 }
 0xb1a   : > { %2184 = vmatpush3.bf16.msra.mxu1 %v2183_v33 }
 0xb1b   : > { %2185 = vmatprep.subr.bf16.mxu1 %v2500_v0 }
 0xb1e   : > { %2187 = vmatpush3.bf16.msra.mxu1 %v2186_v36 }
 0xbe9   : > { %v1569_v19 = vpop.f32.mrb[8].mxu0 }
 0xbea   : > { %v1570_v20 = vadd.f32 %v1947_v18, %v1569_v19  ;;  %v2103_v21 = vpop.f32.mrb[9].mxu0 }
 0xbec   : > { %v1573_v22 = vadd.f32 %v1570_v20, %v2813_v13  ;;  %v1689_v13 = vld [vmem:[%s3049_s10] sm:$0xff] }
 0xbed   : > { %v2189_v39 = vpack.c.bf16 %v1690_v37, %v1689_v13 }
 0xbee   : > { %v1576_v23 = vsel %vm578_vm1, %v1573_v22, 0.0 }
 0xbef   : > { %1577 = vadd.xlane.f32.xlu1 %v1576_v23  ;;  %2190 = vmatpush3.bf16.msra.mxu0 %v2189_v39 }
 0xbf0   : > { %2191 = vmatprep.subr.bf16.mxu0 %v2500_v0 }
 0xbf3   : > { %2193 = vmatpush3.bf16.msra.mxu0 %v2192_v41 }
 0xbf4   : > { %2194 = vmatprep.subr.bf16.mxu0 %v2500_v0 }
 0xbf7   : > { %2196 = vmatpush3.bf16.msra.mxu0 %v2195_v44 }
 0xbf8   : > { %2197 = vmatprep.subr.bf16.mxu0 %v2500_v0  ;;  %v1695_v0 = vld [vmem:[%s3049_s10 + $0x30] sm:$0xff] }
 0xbf9   : > { %v2198_v55 = vpack.c.bf16 %v1696_v54, %v1695_v0 }
 0xbfb   : > { %2199 = vmatpush3.bf16.msra.mxu0 %v2198_v55 }
 0xc7c   : > { %v1578_v26 = vpop.xlane.xlu1 %1577 }
 0xc7d   : > { %v1580_v27 = vmul.f32 0.03125, %v1578_v26 }
 0xc7f   : > { %v1581_v29 = vsub.f32 %v1573_v22, %v1580_v27 }
 0xc81   : > { %v1582_v30 = vmul.f32 %v1581_v29, %v1581_v29 }
 0xc83   : > { %v1583_v31 = vsel %vm578_vm1, %v1582_v30, 0.0 }
 0xc84   : > { %1584 = vadd.xlane.f32.xlu0 %v1583_v31 }
 0xd11   : > { %v1585_v28 = vpop.xlane.xlu0 %1584 }
 0xd12   : > { %v1586_v45 = vmul.f32 0.03125, %v1585_v28 }
 0xd14   : > { %v1587_v47 = vadd.f32 1e-05, %v1586_v45 }
 0xd16   : > { %2333 = vrsqrt.f32 %v1587_v47 }
 0xd20   : > { %v2334_v48 = vpop.eup %2333 }
 0xd21   : > { %v1589_v50 = vmul.f32 %v2334_v48, %v1581_v29 }
 0xd23   : > { %v1596_v52 = vmul.f32 %v1949_v49, %v1589_v50 }
 0xd25   : > { %v1603_v53 = vadd.f32 %v1950_v51, %v1596_v52 }
 0xd27   : > { %2113 = vmatmul.mubr.msk.f32.vlgmr.msra.gmra.mrb[12].mxu1 %vm578_vm1, %v1603_v53 }
 0xdfa   : > { %v1684_v24 = vpop.f32.mrb[12].mxu1 }
 0xdfb   : > { %v1685_v57 = vadd.f32 %v1951_v56, %v1684_v24  ;;  %v2114_v58 = vpop.f32.mrb[13].mxu1 }
 0xdfd   : > { %v1688_v59 = vmax.f32 %v1685_v57, 0.0 }
 0xdff   : > { %2132 = vmatmul.mubr.msk.f32.vlgmr.msra.gmra.mrb[10].mxu0 %vm1704_vm13, %v1688_v59 }
 0xed2   : > { %v1774_v61 = vpop.f32.mrb[10].mxu0 }
 0xed3   : > { %v1775_v62 = vadd.f32 %v1953_v60, %v1774_v61  ;;  %v2133_v63 = vpop.f32.mrb[11].mxu0 }
 0xed5   : > { %v1778_v46 = vadd.f32 %v1775_v62, %v1603_v53 }
 0xed7   : > { %v1781_v2 = vsel %vm578_vm1, %v1778_v46, 0.0 }
 0xed8   : > { %1782 = vadd.xlane.f32.xlu1 %v1781_v2 }
 0xf65   : > { %v1783_v25 = vpop.xlane.xlu1 %1782 }
 0xf66   : > { %v1784_v3 = vmul.f32 0.03125, %v1783_v25 }
 0xf68   : > { %v1785_v4 = vsub.f32 %v1778_v46, %v1784_v3 }
 0xf6a   : > { %v1786_v5 = vmul.f32 %v1785_v4, %v1785_v4 }
 0xf6c   : > { %v1787_v6 = vsel %vm578_vm1, %v1786_v5, 0.0 }
 0xf6d   : > { %1788 = vadd.xlane.f32.xlu0 %v1787_v6 }
 0xffa   : > { %v1789_v7 = vpop.xlane.xlu0 %1788 }
 0xffb   : > { %v1790_v8 = vmul.f32 0.03125, %v1789_v7 }
 0xffd   : > { %v1791_v9 = vadd.f32 1e-05, %v1790_v8 }
 0xfff   : > { %2335 = vrsqrt.f32 %v1791_v9 }
0x1009   : > { %v2336_v10 = vpop.eup %2335 }
0x100a   : > { %v1793_v12 = vmul.f32 %v2336_v10, %v1785_v4 }
0x100c   : > { %v1800_v15 = vmul.f32 %v1955_v11, %v1793_v12 }
0x100e   : > { %v1807_v16 = vadd.f32 %v1956_v14, %v1800_v15 }
0x1010   : > { %1808 = vst.msk [vmem:[%s565_s17] sm:$0xff] %vm578_vm1, %v1807_v16 }
0x1011   : > { %2436 = shalt.err (!%p2433_p2)
}
0x1012   : > { %s2437_s1 = scalar_lea.hbm %s2994_s3, 128  ;;  %s2441_s0 = scalar_lea.hbm %s3098_s2, 256 }
0x1013   : > { %p2438_p13 = scmp.ne.s32.totalorder %s2994_s3, %s2437_s1  ;;  %p2442_p4 = scmp.lt.u32.totalorder %s2994_s3, %s3098_s2 }
0x1014   : > { %p2443_p5 = scmp.lt.u32.totalorder %s2441_s0, %s2437_s1  ;;  %p2445_p11 = scmp.lt.u32.totalorder %s2437_s1, %s2994_s3 }
0x1015   : > { %p2439_p6 = pnand %p2438_p13, %p3099_p0 }
0x1016   : > { %p2444_p8 = por %p2443_p5, %p2442_p4 }
0x1017   : > { %p2440_p10 = pneg %p2439_p6 }
0x1018   : > { %p2446_p1 = por %p2445_p11, %p2444_p8 }
0x101a   : > { %p2447_p3 = pnand %p2446_p1, %p2440_p10 }
0x101c   : > { %2450 = shalt.err (!%p2447_p3)
}
0x101d   : > { %2210 = dma.vmem_to_hbm [thread:$0]  (%p3099_p0), %s2996_s15, 128, %s2994_s3, %s1810_s19  }
0x101e PF: > { %s3100_s26 = sld [smem:[#allocation13_spill]]  ;;  %s3101_s21 = sld [smem:[#allocation14_spill]] }
0x101f   : > { %p3103_p9 = scmp.ge.s32.totalorder %s2493_s24, 2 }
0x1024   : > { %s1835_s30 = sand.u32 1, %s3100_s26   ;;  %p3102_p7 = scmp.ne.s32.totalorder %s3101_s21, 0 }
0x1025   : > { %s1836_s25 = scalar_lea.sflag [#allocation5], %s1835_s30 }
0x1026   : > { %p2224_p12 = pnand %p3103_p9, %p3102_p7 }
0x1028   : > { %2476 = dma.done.wait (!%p2224_p12), %s1836_s25, 128  }
0x1029   : > { %2478 = vsyncadd (!%p2224_p12), %s1836_s25, 4294967168  ;;  %p30_p2 = scmp.ge.s32.totalorder %s2709_s14, 4   ;;  %s3104_s21 = smov %s2485_s22 }
0x102a   : > { %s3105_s22 = smov %s2489_s23  ;;  %s3106_s23 = smov %s2725_s20 }
0x102b   : > { %s3107_s24 = smov %s2709_s14  ;;  %32 = sbr.rel (!%p30_p2) target bundleno = 16 (0x10), region = 137 }
0x1032   :  { %1841 = vsyncpa [#allocation4], 1 }
0x1033   :  { %1843 = vsyncpa [#allocation4 + $0x1], 1 }
0x1034   :  { %1844 = vsyncpa [#allocation7], 1 }
0x1035   :  { %1845 = vsyncpa [#allocation5], 1 }
0x1036   :  { %1847 = vsyncpa [#allocation5 + $0x1], 1 }

// kernel: tpu_custom_call.1
= control target key start
LH: loop header
LB: loop body
LE: loop exit
PB: predicated region body
PF: predicated region fallthrough
CT: control target
= control target key end

     0   :  { %s3039_s0 = inlined_call_operand.hbm [shape: f32[16,32], index: 0, kind: input, shape index: {}]   ;;  %s3040_s1 = inlined_call_operand.hbm [shape: f32[16,32], index: 1, kind: input, shape index: {}]   ;;  %s3041_s2 = inlined_call_operand.vmem [shape: f32[32,32], index: 2, kind: input, shape index: {}]   ;;  %s3042_s3 = inlined_call_operand.vmem [shape: f32[1,32], index: 3, kind: input, shape index: {}]   ;;  %s3043_s4 = inlined_call_operand.vmem [shape: f32[32,64], index: 4, kind: input, shape index: {}]   ;;  %s3044_s5 = inlined_call_operand.vmem [shape: f32[1,64], index: 5, kind: input, shape index: {}]   ;;  %s3045_s6 = inlined_call_operand.vmem [shape: f32[32,32], index: 6, kind: input, shape index: {}]   ;;  %s3046_s7 = inlined_call_operand.vmem [shape: f32[1,32], index: 7, kind: input, shape index: {}]   ;;  %s3047_s8 = inlined_call_operand.hbm [shape: f32[32,64], index: 8, kind: input, shape index: {}]   ;;  %s3048_s9 = inlined_call_operand.vmem [shape: f32[1,64], index: 9, kind: input, shape index: {}]   ;;  %s3049_s10 = inlined_call_operand.vmem [shape: f32[64,32], index: 10, kind: input, shape index: {}]   ;;  %s3050_s11 = inlined_call_operand.vmem [shape: f32[1,32], index: 11, kind: input, shape index: {}]   ;;  %s3051_s12 = inlined_call_operand.vmem [shape: f32[1,32], index: 12, kind: input, shape index: {}]   ;;  %s3052_s13 = inlined_call_operand.vmem [shape: f32[1,32], index: 13, kind: input, shape index: {}]   ;;  %s3053_s14 = inlined_call_operand.vmem [shape: f32[1,32], index: 14, kind: input, shape index: {}]   ;;  %s3054_s15 = inlined_call_operand.vmem [shape: f32[1,32], index: 15, kind: input, shape index: {}]   ;;  %s3055_s16 = inlined_call_operand.hbm [shape: f32[16,32], index: 16, kind: output, shape index: {}]  }
   0x1   :  { %3064 = sst [smem:[#allocation15_spill]] %s3039_s0 }
   0x2   :  { %3065 = sst [smem:[#allocation16_spill]] %s3040_s1 }
   0x3   :  { %3066 = sst [smem:[#allocation17_spill]] %s3041_s2 }
   0x4   :  { %3067 = sst [smem:[#allocation18_spill]] %s3042_s3 }
   0x5   :  { %3068 = sst [smem:[#allocation19_spill]] %s3048_s9 }
   0x6   :  { %3069 = sst [smem:[#allocation20_spill]] %s3050_s11 }
   0x7   :  { %3070 = sst [smem:[#allocation21_spill]] %s3053_s14 }
   0x8   :  { %3071 = sst [smem:[#allocation22_spill]] %s3054_s15 }
   0x9   :  { %3072 = sst [smem:[#allocation23_spill]] %s3055_s16 }
   0xa   :  { %21 = vsyncpa [#allocation4], 0 }
   0xb   :  { %23 = vsyncpa [#allocation4 + $0x1], 0 }
   0xc   :  { %24 = vsyncpa [#allocation7], 0 }
   0xd   :  { %25 = vsyncpa [#allocation5], 0 }
   0xe   :  { %27 = vsyncpa [#allocation5 + $0x1], 0  ;;  %s2599_s21 = smov 0   ;;  %s2601_s22 = smov 0  }
   0xf   :  { %s2603_s23 = smov 0   ;;  %s2605_s24 = smov 0  }
  0x10 LB: > { %3073 = sst [smem:[#allocation13_spill]] %s2481_s21  ;;  %s2620_s25 = sadd.s32 4294967295, %s2493_s24   ;;  %s2493_s24 = sphi %s2605_s24, %s3107_s24   ;;  %s2489_s23 = sphi %s2603_s23, %s3106_s23   ;;  %s2485_s22 = sphi %s2601_s22, %s3105_s22   ;;  %s2481_s21 = sphi %s2599_s21, %s3104_s21  }
  0x11   : > { %s1912_s26 = sadd.s32 4294967294, %s2493_s24   ;;  %p53_p0 = scmp.ne.s32.totalorder %s2485_s22, %s2481_s21 }
  0x12   : > { %p3060_p1 = scmp.eq.s32.totalorder %s2620_s25, 0  ;;  %p398_p3 = scmp.eq.s32.totalorder %s1912_s26, 1 }
  0x13   : > { %p1913_p5 = scmp.ge.s32.totalorder %s2493_s24, 1  ;;  %p405_p7 = scmp.lt.s32.totalorder %s2493_s24, 3 }
  0x14   : > { %p2629_p4 = por %p3060_p1, %p53_p0  ;;  %p2634_p6 = por %p398_p3, %p53_p0 }
  0x15   : > { %p2639_p8 = pnand %p1913_p5, %p405_p7  ;;  %s2495_s30 = smov [#allocation6]  }
  0x16   : > { %s3074_s27 = scalar_select %p2629_p4, 1, 0 }
  0x17   : > { %s3075_s28 = scalar_select %p2634_p6, 1, 0 }
  0x18   : > { %s417_s0 = sshll.u32 %s2495_s30, 4  ;;  %p2212_p9 = pneg %p2639_p8  ;;  %s2643_s0 = int_to_ptr.vmem [resolvable:$true] %s417_s0 }
  0x19   : > { %3076 = sst [smem:[#allocation14_spill]] %s3075_s28  ;;  %s2496_s18 = smov [#allocation8]  }
  0x1a   : > { %p2650_p11 = pnand %p2212_p9, %p3060_p1  ;;  %s448_s19 = sshll.u32 %s2496_s18, 4  ;;  %s2654_s19 = int_to_ptr.vmem [resolvable:$true] %s448_s19 }
  0x1b   : > { %s3079_s1 = sld [smem:[#allocation16_spill]] }
  0x1c   : > { %p2339_p13 = pneg %p2650_p11 }
  0x21   : > { %s2337_s30 = scalar_lea.hbm %s3079_s1, 256 }
  0x22   : > { %p2338_p12 = scmp.ne.s32.totalorder %s3079_s1, %s2337_s30  ;;  %p2344_p5 = scmp.lt.u32.totalorder %s2337_s30, %s3079_s1 }
  0x24   : > { %p2340_p0 = pnand %p2339_p13, %p2338_p12 }
  0x26   : > { %p2341_p3 = pneg %p2340_p0 }
  0x28   : > { %p2346_p7 = pnand %p2344_p5, %p2341_p3 }
  0x2a   : > { %2349 = shalt.err (!%p2346_p7)
}
  0x2b   : > { %s2350_s18 = scalar_lea.vmem %s2643_s0, 256  ;;  %p2358_p2 = scmp.lt.s32.totalorder %s2643_s0, %s2643_s0 }
  0x2c   : > { %p2351_p9 = scmp.ne.s32.totalorder %s2643_s0, %s2350_s18  ;;  %p2359_p12 = scmp.lt.s32.totalorder %s2350_s18, %s2350_s18 }
  0x2e   : > { %p2353_p10 = pnand %p2351_p9, %p2339_p13  ;;  %p2360_p0 = por %p2359_p12, %p2358_p2 }
  0x30   : > { %p2354_p1 = pneg %p2353_p10 }
  0x32   : > { %p2361_p6 = pnand %p2360_p0, %p2354_p1 }
  0x34   : > { %2364 = shalt.err (!%p2361_p6)
}
  0x35   : > { %s2497_s15 = smov 128   ;;  %s2498_s16 = smov 8  }
  0x36   : > { %2215 = dma.hbm_to_vmem [thread:$0]  (!%p2650_p11), %s3079_s1, 256, %s2643_s0, [#allocation7], %s2497_s15, %s2497_s15, %s2498_s16  }
  0x37   : > { %s2365_s30 = scalar_lea.hbm %s3047_s8, 512 }
  0x38   : > { %p2366_p2 = scmp.ne.s32.totalorder %s3047_s8, %s2365_s30  ;;  %p2372_p10 = scmp.lt.u32.totalorder %s2365_s30, %s3047_s8 }
  0x3a   : > { %p2368_p1 = pnand %p2366_p2, %p2339_p13 }
  0x3c   : > { %p2369_p6 = pneg %p2368_p1 }
  0x3e   : > { %p2374_p3 = pnand %p2372_p10, %p2369_p6 }
  0x40   : > { %2377 = shalt.err (!%p2374_p3)
}
  0x41   : > { %s2378_s0 = scalar_lea.vmem %s2654_s19, 512  ;;  %p2386_p12 = scmp.lt.s32.totalorder %s2654_s19, %s2654_s19 }
  0x42   : > { %p2379_p5 = scmp.ne.s32.totalorder %s2654_s19, %s2378_s0  ;;  %p2387_p0 = scmp.lt.s32.totalorder %s2378_s0, %s2378_s0 }
  0x44   : > { %p2381_p7 = pnand %p2379_p5, %p2339_p13  ;;  %p2388_p2 = por %p2387_p0, %p2386_p12 }
  0x46   : > { %p2382_p9 = pneg %p2381_p7 }
  0x48   : > { %p2389_p1 = pnand %p2388_p2, %p2382_p9 }
  0x4a   : > { %2392 = shalt.err (!%p2389_p1)
}
  0x4b   : > { %2218 = dma.hbm_to_vmem [thread:$0]  (!%p2650_p11), %s3047_s8, 512, %s2654_s19, [#allocation7], %s2497_s15, %s2497_s15, %s2498_s16  }
  0x4c   : > { %s2709_s14 = sadd.s32 1, %s2493_s24   ;;  %s40_s17 = sadd.s32 1, %s2489_s23 }
  0x4d   : > { %s37_s21 = ssub.s32 %s2493_s24, %s2709_s14  ;;  %p47_p13 = scmp.ne.s32.totalorder %s2489_s23, %s2485_s22 }
  0x4e   : > { %p38_p6 = scmp.eq.s32.totalorder %s37_s21, 0  ;;  %p48_p10 = scmp.eq.s32.totalorder %s2493_s24, 0 }
  0x4f   : > { %p3080_p3 = scmp.eq.s32.totalorder %s2620_s25, 1  ;;  %p2229_p7 = scmp.lt.s32.totalorder %s2493_s24, 2 }
  0x50   : > { %s2725_s20 = scalar_select %p38_p6, %s2489_s23, %s40_s17  }
  0x51   : > { %p2719_p5 = por %p3080_p3, %p47_p13  ;;  %p49_p9 = por %p48_p10, %p47_p13 }
  0x52   : > { %s483_s26 = sand.u32 1, %s2489_s23   ;;  %s1918_s19 = sshll.u32 %s2493_s24, 7 }
  0x53   : > { %s3081_s28 = scalar_select %p2719_p5, 1, 0 }
  0x54   : > { %s1917_s30 = sshll.u32 %s483_s26, 3  ;;  %s3082_s18 = sld [smem:[#allocation15_spill]] }
  0x55   : > { %s487_s9 = scalar_lea.vmem [#allocation3], %s1917_s30  ;;  %p2736_p11 = pnand %p2229_p7, %p49_p9 }
  0x56   : > { %s494_s11 = sshll.u32 %s487_s9, 4  ;;  %s484_s21 = scalar_lea.sflag [#allocation4], %s483_s26  ;;  %s2734_s11 = int_to_ptr.vmem [resolvable:$true] %s494_s11 }
  0x57   : > { %p2395_p0 = pneg %p2736_p11 }
  0x5a   : > { %s2732_s0 = scalar_lea.hbm %s3082_s18, %s1918_s19  ;;  %s2398_s15 = scalar_lea.hbm %s3082_s18, 256 }
  0x5b   : > { %s2393_s1 = scalar_lea.hbm %s2732_s0, 128  ;;  %p2399_p13 = scmp.lt.u32.totalorder %s2732_s0, %s3082_s18 }
  0x5c   : > { %p2394_p12 = scmp.ne.s32.totalorder %s2732_s0, %s2393_s1  ;;  %p2400_p6 = scmp.lt.u32.totalorder %s2398_s15, %s2393_s1 }
  0x5d   : > { %p2402_p3 = scmp.lt.u32.totalorder %s2393_s1, %s2732_s0 }
  0x5e   : > { %p2396_p2 = pnand %p2395_p0, %p2394_p12  ;;  %p2401_p10 = por %p2400_p6, %p2399_p13 }
  0x60   : > { %p2397_p1 = pneg %p2396_p2  ;;  %p2403_p7 = por %p2402_p3, %p2401_p10 }
  0x62   : > { %p2404_p9 = pnand %p2403_p7, %p2397_p1 }
  0x64   : > { %2407 = shalt.err (!%p2404_p9)
}
  0x65   : > { %s2408_s26 = scalar_lea.vmem %s2734_s11, 128  ;;  %s2499_s19 = smov [#allocation3]  }
  0x66   : > { %p2409_p12 = scmp.ne.s32.totalorder %s2734_s11, %s2408_s26  ;;  %s2413_s30 = sshll.u32 %s2499_s19, 4  ;;  %s2414_s30 = int_to_ptr.vmem [resolvable:$false] %s2413_s30 }
  0x67   : > { %s2415_s16 = scalar_lea.vmem %s2414_s30, 256  ;;  %p2416_p4 = scmp.lt.s32.totalorder %s2734_s11, %s2414_s30 }
  0x68   : > { %p2411_p2 = pnand %p2409_p12, %p2395_p0  ;;  %p2417_p13 = scmp.lt.s32.totalorder %s2415_s16, %s2408_s26 }
  0x6a   : > { %p2412_p5 = pneg %p2411_p2  ;;  %p2418_p6 = por %p2417_p13, %p2416_p4 }
  0x6c   : > { %p2419_p10 = pnand %p2418_p6, %p2412_p5 }
  0x6e   : > { %2422 = shalt.err (!%p2419_p10)
}
  0x6f   : > { %2222 = dma.hbm_to_vmem [thread:$0]  (!%p2736_p11), %s2732_s0, 128, %s2734_s11, %s484_s21  }
  0x70   : > { %503 = sbr.rel (%p2639_p8) target bundleno = 4126 (0x101e), region = 84  ;;  %s2768_s1 = sand.u32 (!%p2639_p8), 1, %s2485_s22  }
  0x71   : > { %s3063_s15 = sshll.u32 (!%p2639_p8), %s2768_s1, 3  ;;  %s506_s9 = scalar_lea.sflag (!%p2639_p8), [#allocation4], %s2768_s1 }
  0x72   : > { %s509_s26 = scalar_lea.vmem (!%p2639_p8), [#allocation3], %s3063_s15  ;;  %p3084_p4 = scmp.ne.s32.totalorder (!%p2639_p8), %s3074_s27, 0 }
  0x77   : > { %2468 = dma.done.wait (%p3084_p4), %s506_s9, 128  }
  0x78   : > { %2470 = vsyncadd (%p3084_p4), %s506_s9, 4294967168  ;;  %p3085_p5 = scmp.eq.s32.totalorder %s2620_s25, 0 }
  0x7a   : > { %2472 = dma.done.wait (%p3085_p5), [#allocation7], 768   ;;  %p3086_p8 = pmov %p3085_p5 }
  0x7b   : > { %v2500_v0 = vmov 0.0|0.0   ;;  %vm2501_vm0 = vmmov 0   ;;  %v2502_v1 = vmov 0.0   ;;  %s3087_s2 = sld [smem:[#allocation17_spill]]  ;;  %v654_v7 = vld [vmem:[%s3043_s4] sm:$0xff]  ;;  %v655_v8 = vld [vmem:[%s3043_s4 + $0x8] sm:$0xff]  ;;  %v747_v33 = vlaneseq }
  0x7c   : > { %2474 = vsyncadd (%p3086_p8), [#allocation7], 4294966528  ;;  %2134 = vmatprep.subr.bf16.mxu1 %v2500_v0  ;;  %2023 = vmatprep.mubr.msk.f32.mxu1 %vm2501_vm0, %v2502_v1  ;;  %v2140_v10 = vpack.c.bf16 %v655_v8, %v654_v7  ;;  %v656_v11 = vld [vmem:[%s3043_s4 + $0x10] sm:$0xff]  ;;  %v657_v12 = vld [vmem:[%s3043_s4 + $0x18] sm:$0xff]  ;;  %vm578_vm1 = vcmask 261120   ;;  %vm778_vm2 = vcmask 64512  }
  0x7d   : > { %2148 = vmatprep.subr.bf16.mxu0 %v2500_v0  ;;  %2041 = vmatprep.mubr.msk.f32.mxu0 %vm2501_vm0, %v2502_v1  ;;  %v2813_v13 = vld [vmem:[%s509_s26] sm:$0xff]  ;;  %v2144_v14 = vpack.c.bf16 %v657_v12, %v656_v11  ;;  %v652_v15 = vld [vmem:[#allocation6] sm:$0xff]  ;;  %v653_v16 = vld [vmem:[#allocation6 + $0x8] sm:$0xff]  ;;  %s2503_s21 = smov 96   ;;  %s3090_s3 = sld [smem:[#allocation18_spill]]  ;;  %v748_v34 = vshrl.u32 %v747_v33, 7 }
  0x7e   : > { %v1926_v19 = vld [vmem:[%s3044_s5] ss:$0 sm:$0xff]  ;;  %vm2827_vm3 = vmpackc.low %vm778_vm2, %vm778_vm2  ;;  %s2504_s16 = smov 120   ;;  %s1929_s9 = sshll.u32 %s2620_s25, 3  ;;  %v752_v42 = vand.u32 127, %v747_v33  ;;  %vm859_vm9 = vcmask 130048  }
  0x7f   : > { %v749_v35 = vstv %s1929_s9  ;;  %s2505_s27 = smov 88   ;;  %s2506_s29 = smov 112   ;;  %vm1128_vm10 = vcmask 130112   ;;  %vm1307_vm11 = vcmask 195712   ;;  %vm1486_vm12 = vcmask 261312  }
  0x80   : > { %v750_v36 = vadd.s32 %v749_v35, %v748_v34  ;;  %v769_v44 = vand.u32 1, %v752_v42  ;;  %s2507_s0 = smov 80   ;;  %s2508_s11 = smov 104   ;;  %vm1704_vm13 = vcmask 523264  }
  0x81   : > { %v567_v2 = vld [vmem:[%s3087_s2] sm:$0xff]  ;;  %v568_v3 = vld [vmem:[%s3087_s2 + $0x8] sm:$0xff]  ;;  %v569_v4 = vld [vmem:[%s3087_s2 + $0x10] sm:$0xff]  ;;  %s2509_s17 = smov 72   ;;  %s2510_s15 = smov 16  }
  0x82   : > { %v2135_v5 = vpack.c.bf16 %v568_v3, %v567_v2  ;;  %v570_v6 = vld [vmem:[%s3087_s2 + $0x18] sm:$0xff]  ;;  %v754_v37 = vsub.s32 0, %v750_v36  ;;  %vm753_vm4 = vcmp.lt.s32.totalorder %v750_v36, 0  ;;  %s2511_s26 = smov 8   ;;  %s3098_s2 = sld [smem:[#allocation23_spill]] }
  0x83   : > { %v2138_v9 = vpack.c.bf16 %v570_v6, %v569_v4  ;;  %v1924_v27 = vld [vmem:[%s3090_s3] ss:$0 sm:$0xff]  ;;  %s1810_s19 = scalar_lea.sflag [#allocation5], %s2768_s1  ;;  %p3099_p0 = scmp.ne.s32.totalorder %s3081_s28, 0 }
  0x84   : > { %2136 = vmatpush3.bf16.msra.mxu1 %v2135_v5  ;;  %v1930_v38 = vmin.u32 %v754_v37, %v750_v36 }
  0x85   : > { %2137 = vmatprep.subr.bf16.mxu1 %v2500_v0 }
  0x86   : > { %v757_v39 = vand.u32 1, %v1930_v38 }
  0x88   : > { %2139 = vmatpush3.bf16.msra.mxu1 %v2138_v9  ;;  %v758_v40 = vsub.s32 0, %v757_v39 }
  0x89   : > { %2141 = vmatprep.subr.bf16.mxu1 %v2140_v10 }
  0x8a   : > { %v759_v41 = vsel %vm753_vm4, %v758_v40, %v757_v39 }
  0x8b   : > { %2024 = vmatmul.mubr.msk.f32.vlgmr.msra.gmra.mrb[0].mxu1 %vm578_vm1, %v2813_v13  ;;  %vm760_vm5 = vcmp.ne.s32.totalorder %v759_v41, 0  ;;  %vm761_vm6 = vcmp.lt.s32.totalorder %v759_v41, 0  ;;  %v763_v43 = vadd.s32 2, %v759_v41 }
  0x8c   : > { %2143 = vmatpush3.bf16.msra.mxu1 %v2140_v10  ;;  %2034 = vmatprep.mubr.msk.f32.mxu1 %vm578_vm1, %v652_v15  ;;  %vm762_vm7 = vmand %vm761_vm6, %vm760_vm5 }
  0x8d   : > { %2145 = vmatprep.subr.bf16.mxu1 %v2144_v14  ;;  %v764_v45 = vsel %vm762_vm7, %v763_v43, %v759_v41 }
  0x8e   : > { %vm2850_vm8 = vcmp.eq.s32.totalorder %v764_v45, %v769_v44 }
  0x90   : > { %2147 = vmatpush3.bf16.msra.mxu1 %v2144_v14 }
  0x91   : > { %2152 = vmatprep.subr.bf16.mxu1 %v2500_v0 }
  0x93   : > { %2035 = vmatmul.mubr.msk.f32.vlgmr.msra.gmra.mrb[2].mxu1 %vm578_vm1, %v653_v16 }
  0x94   : > { %2048 = vmatprep.mubr.msk.f32.mxu1 %vm2501_vm0, %v2502_v1 }
 0x15e   : > { %v648_v17 = vpop.f32.mrb[0].mxu1 }
 0x15f   : > { %v2025_v18 = vpop.f32.mrb[1].mxu1  ;;  %v2842_v28 = vadd.f32 %v1924_v27, %v648_v17 }
 0x166   : > { %v2036_v20 = vpop.f32.mrb[2].mxu1 }
 0x167   : > { %v743_v21 = vadd.f32 %v2036_v20, %v1926_v19  ;;  %v737_v22 = vpop.f32.mrb[3].mxu1 }
 0x168   : > { %v738_v23 = vadd.f32 %v1926_v19, %v737_v22 }
 0x16a   : > { %v2831_v25 = vpack.i.bf16 %v743_v21, %v738_v23  ;;  %v2149_v26 = vpack.c.bf16 %v743_v21, %v738_v23 }
 0x16c   : > { %2283 = vrot.lane.b32.xlu1 %v2831_v25, %s2503_s21  ;;  %2151 = vmatpush3.bf16.xpose.msk.msra.mxu0 %vm2827_vm3, %v2149_v26  ;;  %s3094_s21 = sld [smem:[#allocation20_spill]] }
 0x16d   : > { %2159 = vmatprep.subr.bf16.mxu0 %v2500_v0 }
 0x170   : > { %2288 = vrot.lane.b32.xlu1 %v2831_v25, %s2504_s16 }
 0x173   : > { %2042 = vmatmul.mubr.msk.f32.vlgmr.msra.gmra.mrb[0].mxu0 %vm778_vm2, %v2842_v28 }
 0x174   : > { %2062 = vmatprep.mubr.msk.f32.mxu0 %vm2501_vm0, %v2502_v1 }
 0x1de   : > { %v2284_v29 = vpop.permute.xlu1 %2283 }
 0x1df   : > { %v2286_v30 = vunpack.i.h.bf16 %v2284_v29  ;;  %v2285_v31 = vunpack.i.l.bf16 %v2284_v29 }
 0x1e1   : > { %v2153_v32 = vpack.c.bf16 %v2286_v30, %v2285_v31 }
 0x1e2   : > { %v2289_v57 = vpop.permute.xlu1 %2288 }
 0x1e3   : > { %2154 = vmatpush3.bf16.msra.mxu1 %v2153_v32  ;;  %v2291_v58 = vunpack.i.h.bf16 %v2289_v57  ;;  %v2290_v59 = vunpack.i.l.bf16 %v2289_v57 }
 0x1e4   : > { %2155 = vmatprep.subr.bf16.mxu1 %v2500_v0 }
 0x1e5   : > { %v2156_v62 = vpack.c.bf16 %v2291_v58, %v2290_v59 }
 0x246   : > { %v854_v47 = vpop.f32.mrb[0].mxu0 }
 0x247   : > { %v858_v48 = vsel %vm2850_vm8, %v854_v47, -1e+30  ;;  %v2043_v49 = vpop.f32.mrb[1].mxu0 }
 0x248   : > { %v860_v50 = vsel %vm859_vm9, %v858_v48, -inf }
 0x249   : > { %861 = vmax.xlane.f32.xlu0 %v860_v50 }
 0x2d6   : > { %v862_v51 = vpop.xlane.xlu0 %861 }
 0x2d7   : > { %v863_v52 = vsub.f32 %v858_v48, %v862_v51 }
 0x2d9   : > { %v864_v53 = vmul.f32 1.442695, %v863_v52 }
 0x2db   : > { %2317 = vpow2.f32 %v864_v53 }
 0x2e5   : > { %v2318_v54 = vpop.eup %2317 }
 0x2e6   : > { %v866_v55 = vsel %vm859_vm9, %v2318_v54, 0.0 }
 0x2e7   : > { %867 = vadd.xlane.f32.xlu0 %v866_v55 }
 0x2fd   : > { %951 = vrot.lane.b32.xlu0 %v2842_v28, %s2504_s16  ;;  %s3095_s16 = sld [smem:[#allocation21_spill]] }
 0x374   : > { %v868_v56 = vpop.xlane.xlu0 %867 }
 0x375   : > { %2319 = vrcp.f32 %v868_v56 }
 0x378   : > { %v952_v63 = vpop.permute.xlu0 %951 }
 0x37f   : > { %v2320_v60 = vpop.eup %2319 }
 0x380   : > { %v870_v61 = vmul.f32 %v2320_v60, %v2318_v54 }
 0x382   : > { %2049 = vmatmul.mubr.msk.f32.vlgmr.msra.gmra.mrb[4].mxu1 %vm859_vm9, %v870_v61 }
 0x383   : > { %2158 = vmatpush3.bf16.xpose.msk.msra.mxu1 %vm2827_vm3, %v2156_v62  ;;  %2055 = vmatprep.mubr.msk.f32.mxu1 %vm2501_vm0, %v2502_v1 }
 0x384   : > { %2166 = vmatprep.subr.bf16.mxu1 %v2500_v0 }
 0x38a   : > { %2056 = vmatmul.mubr.msk.f32.vlgmr.msra.gmra.mrb[6].mxu1 %vm778_vm2, %v952_v63 }
 0x38b   : > { %2076 = vmatprep.mubr.msk.f32.mxu1 %vm2501_vm0, %v2502_v1 }
 0x455   : > { %v946_v2 = vpop.f32.mrb[4].mxu1 }
 0x456   : > { %950 = vst.msk [vmem:[#allocation2] sm:$0xff] %vm778_vm2, %v946_v2  ;;  %v2050_v3 = vpop.f32.mrb[5].mxu1 }
 0x45d   : > { %v1029_v4 = vpop.f32.mrb[6].mxu1 }
 0x45e   : > { %v1033_v5 = vsel %vm2850_vm8, %v1029_v4, -1e+30  ;;  %v2057_v6 = vpop.f32.mrb[7].mxu1 }
 0x45f   : > { %v1034_v7 = vsel %vm859_vm9, %v1033_v5, -inf }
 0x460   : > { %1035 = vmax.xlane.f32.xlu1 %v1034_v7  ;;  %v1489_v7 = vld [vmem:[%s3045_s6] sm:$0xff] }
 0x471   : > { %2293 = vrot.lane.b32.xlu1 %v2831_v25, %s2505_s27 }
 0x475   : > { %1130 = vrot.lane.b32.xlu1 %v2842_v28, %s2506_s29 }
 0x4ed   : > { %v1036_v8 = vpop.xlane.xlu1 %1035 }
 0x4ee   : > { %v1037_v9 = vsub.f32 %v1033_v5, %v1036_v8  ;;  %v1490_v8 = vld [vmem:[%s3045_s6 + $0x8] sm:$0xff] }
 0x4f0   : > { %v1038_v10 = vmul.f32 1.442695, %v1037_v9  ;;  %v2177_v9 = vpack.c.bf16 %v1490_v8, %v1489_v7 }
 0x4f1   : > { %v2294_v11 = vpop.permute.xlu1 %2293 }
 0x4f2   : > { %2321 = vpow2.f32 %v1038_v10  ;;  %v2296_v12 = vunpack.i.h.bf16 %v2294_v11  ;;  %v2295_v14 = vunpack.i.l.bf16 %v2294_v11  ;;  %v1491_v10 = vld [vmem:[%s3045_s6 + $0x10] sm:$0xff]  ;;  %v1492_v11 = vld [vmem:[%s3045_s6 + $0x18] sm:$0xff] }
 0x4f4   : > { %v2160_v15 = vpack.c.bf16 %v2296_v12, %v2295_v14  ;;  %v2180_v12 = vpack.c.bf16 %v1492_v11, %v1491_v10  ;;  %v1955_v11 = vld [vmem:[%s3095_s16] ss:$0 sm:$0xff] }
 0x4f5   : > { %v1131_v27 = vpop.permute.xlu1 %1130 }
 0x4f6   : > { %2161 = vmatpush3.bf16.msra.mxu0 %v2160_v15 }
 0x4f7   : > { %2162 = vmatprep.subr.bf16.mxu0 %v2500_v0 }
 0x4fc   : > { %v2322_v16 = vpop.eup %2321 }
 0x4fd   : > { %v1040_v17 = vsel %vm859_vm9, %v2322_v16, 0.0 }
 0x4fe   : > { %1041 = vadd.xlane.f32.xlu0 %v1040_v17 }
 0x514   : > { %2298 = vrot.lane.b32.xlu0 %v2831_v25, %s2506_s29  ;;  %s3096_s29 = sld [smem:[#allocation22_spill]] }
 0x58b   : > { %v1042_v18 = vpop.xlane.xlu0 %1041 }
 0x58c   : > { %2323 = vrcp.f32 %v1042_v18  ;;  %v1947_v18 = vld [vmem:[%s3046_s7] ss:$0 sm:$0xff] }
 0x58f   : > { %v2299_v19 = vpop.permute.xlu0 %2298 }
 0x590   : > { %v2301_v20 = vunpack.i.h.bf16 %v2299_v19  ;;  %v2300_v21 = vunpack.i.l.bf16 %v2299_v19 }
 0x592   : > { %v2163_v26 = vpack.c.bf16 %v2301_v20, %v2300_v21 }
 0x596   : > { %v2324_v22 = vpop.eup %2323 }
 0x597   : > { %v1044_v23 = vmul.f32 %v2324_v22, %v2322_v16 }
 0x599   : > { %2063 = vmatmul.mubr.msk.f32.vlgmr.msra.gmra.mrb[2].mxu0 %vm859_vm9, %v1044_v23 }
 0x59a   : > { %2165 = vmatpush3.bf16.xpose.msk.msra.mxu0 %vm2827_vm3, %v2163_v26  ;;  %2069 = vmatprep.mubr.msk.f32.mxu0 %vm2501_vm0, %v2502_v1 }
 0x59b   : > { %2173 = vmatprep.subr.bf16.mxu0 %v2500_v0 }
 0x5a1   : > { %2070 = vmatmul.mubr.msk.f32.vlgmr.msra.gmra.mrb[4].mxu0 %vm778_vm2, %v1131_v27 }
 0x5a2   : > { %2090 = vmatprep.mubr.msk.f32.mxu0 %vm2501_vm0, %v2502_v1 }
 0x66c   : > { %v2887_v29 = vpop.f32.mrb[2].mxu0 }
 0x66d   : > { %v2064_v30 = vpop.f32.mrb[3].mxu0 }
 0x674   : > { %v1208_v31 = vpop.f32.mrb[4].mxu0 }
 0x675   : > { %v1212_v32 = vsel %vm2850_vm8, %v1208_v31, -1e+30  ;;  %v2071_v33 = vpop.f32.mrb[5].mxu0 }
 0x676   : > { %v1213_v34 = vsel %vm859_vm9, %v1212_v32, -inf }
 0x677   : > { %1214 = vmax.xlane.f32.xlu1 %v1213_v34  ;;  %v1606_v34 = vld [vmem:[#allocation8 + $0x10] sm:$0xff] }
 0x688   : > { %2303 = vrot.lane.b32.xlu1 %v2831_v25, %s2507_s0  ;;  %s1958_s0 = sshll.u32 %s2620_s25, 7  ;;  %s2513_s25 = smov [#allocation9]  }
 0x689   : > { %s2994_s3 = scalar_lea.hbm %s3098_s2, %s1958_s0  ;;  %s2427_s16 = sshll.u32 %s2513_s25, 4  ;;  %s2428_s16 = int_to_ptr.vmem [resolvable:$false] %s2427_s16 }
 0x68a   : > { %s2429_s9 = scalar_lea.vmem %s2428_s16, 256 }
 0x68c   : > { %1309 = vrot.lane.b32.xlu1 %v2842_v28, %s2508_s11 }
 0x704   : > { %v1215_v35 = vpop.xlane.xlu1 %1214 }
 0x705   : > { %v1216_v36 = vsub.f32 %v1212_v32, %v1215_v35  ;;  %v1605_v32 = vld [vmem:[#allocation8 + $0x8] sm:$0xff]  ;;  %v1607_v35 = vld [vmem:[#allocation8 + $0x18] sm:$0xff] }
 0x707   : > { %v1217_v37 = vmul.f32 1.442695, %v1216_v36  ;;  %v2186_v36 = vpack.c.bf16 %v1607_v35, %v1606_v34 }
 0x708   : > { %v2304_v38 = vpop.permute.xlu1 %2303 }
 0x709   : > { %2325 = vpow2.f32 %v1217_v37  ;;  %v2306_v39 = vunpack.i.h.bf16 %v2304_v38  ;;  %v2305_v40 = vunpack.i.l.bf16 %v2304_v38  ;;  %v1690_v37 = vld [vmem:[%s3049_s10 + $0x8] sm:$0xff]  ;;  %v1691_v38 = vld [vmem:[%s3049_s10 + $0x10] sm:$0xff] }
 0x70b   : > { %v2167_v41 = vpack.c.bf16 %v2306_v39, %v2305_v40  ;;  %v1692_v40 = vld [vmem:[%s3049_s10 + $0x18] sm:$0xff] }
 0x70c   : > { %v1310_v51 = vpop.permute.xlu1 %1309 }
 0x70d   : > { %2168 = vmatpush3.bf16.msra.mxu1 %v2167_v41  ;;  %v2192_v41 = vpack.c.bf16 %v1692_v40, %v1691_v38 }
 0x70e   : > { %2169 = vmatprep.subr.bf16.mxu1 %v2500_v0 }
 0x713   : > { %v2326_v42 = vpop.eup %2325 }
 0x714   : > { %v1219_v43 = vsel %vm859_vm9, %v2326_v42, 0.0 }
 0x715   : > { %1220 = vadd.xlane.f32.xlu0 %v1219_v43  ;;  %v1694_v43 = vld [vmem:[%s3049_s10 + $0x28] sm:$0xff] }
 0x72b   : > { %2308 = vrot.lane.b32.xlu0 %v2831_v25, %s2508_s11  ;;  %s2512_s11 = smov 24  }
 0x7a2   : > { %v1221_v44 = vpop.xlane.xlu0 %1220 }
 0x7a3   : > { %2327 = vrcp.f32 %v1221_v44 }
 0x7a6   : > { %v2309_v28 = vpop.permute.xlu0 %2308 }
 0x7a7   : > { %v2311_v45 = vunpack.i.h.bf16 %v2309_v28  ;;  %v2310_v47 = vunpack.i.l.bf16 %v2309_v28 }
 0x7a9   : > { %v2170_v50 = vpack.c.bf16 %v2311_v45, %v2310_v47 }
 0x7ad   : > { %v2328_v48 = vpop.eup %2327 }
 0x7ae   : > { %v1223_v49 = vmul.f32 %v2328_v48, %v2326_v42  ;;  %v1693_v42 = vld [vmem:[%s3049_s10 + $0x20] sm:$0xff] }
 0x7af   : > { %v2195_v44 = vpack.c.bf16 %v1694_v43, %v1693_v42 }
 0x7b0   : > { %2077 = vmatmul.mubr.msk.f32.vlgmr.msra.gmra.mrb[8].mxu1 %vm859_vm9, %v1223_v49  ;;  %v1949_v49 = vld [vmem:[%s3051_s12] ss:$0 sm:$0xff] }
 0x7b1   : > { %2172 = vmatpush3.bf16.xpose.msk.msra.mxu1 %vm2827_vm3, %v2170_v50  ;;  %2083 = vmatprep.mubr.msk.f32.mxu1 %vm2501_vm0, %v2502_v1 }
 0x7b2   : > { %2182 = vmatprep.subr.bf16.mxu1 %v2500_v0 }
 0x7b8   : > { %2084 = vmatmul.mubr.msk.f32.vlgmr.msra.gmra.mrb[10].mxu1 %vm778_vm2, %v1310_v51  ;;  %v1950_v51 = vld [vmem:[%s3052_s13] ss:$0 sm:$0xff] }
 0x7b9   : > { %2112 = vmatprep.mubr.msk.f32.mxu1 %vm2501_vm0, %v2502_v1 }
 0x883   : > { %v1299_v52 = vpop.f32.mrb[8].mxu1 }
 0x884   : > { %v2078_v53 = vpop.f32.mrb[9].mxu1 }
 0x88b   : > { %v1387_v54 = vpop.f32.mrb[10].mxu1 }
 0x88c   : > { %v1391_v55 = vsel %vm2850_vm8, %v1387_v54, -1e+30  ;;  %v2085_v56 = vpop.f32.mrb[11].mxu1  ;;  %v1696_v54 = vld [vmem:[%s3049_s10 + $0x38] sm:$0xff] }
 0x88d   : > { %v1392_v24 = vsel %vm859_vm9, %v1391_v55, -inf }
 0x88e   : > { %1393 = vmax.xlane.f32.xlu1 %v1392_v24 }
 0x89f   : > { %2313 = vrot.lane.b32.xlu1 %v2831_v25, %s2509_s17  ;;  %s3093_s17 = sld [smem:[#allocation19_spill]] }
 0x8a3   : > { %1304 = vrot.lane.b32.xlu1 %v1299_v52, %s2510_s15 }
 0x8a5   : > { %v1951_v56 = vld [vmem:[%s3093_s17] ss:$0 sm:$0xff] }
 0x91b   : > { %v1394_v57 = vpop.xlane.xlu1 %1393 }
 0x91c   : > { %v1395_v58 = vsub.f32 %v1391_v55, %v1394_v57 }
 0x91e   : > { %v1396_v59 = vmul.f32 1.442695, %v1395_v58 }
 0x91f   : > { %v2314_v60 = vpop.permute.xlu1 %2313 }
 0x920   : > { %2329 = vpow2.f32 %v1396_v59  ;;  %v2316_v61 = vunpack.i.h.bf16 %v2314_v60  ;;  %v2315_v62 = vunpack.i.l.bf16 %v2314_v60  ;;  %v1953_v60 = vld [vmem:[%s3094_s21] ss:$0 sm:$0xff] }
 0x922   : > { %v2174_v63 = vpack.c.bf16 %v2316_v61, %v2315_v62 }
 0x923   : > { %v1305_v4 = vpop.permute.xlu1 %1304 }
 0x924   : > { %2175 = vmatpush3.bf16.msra.mxu0 %v2174_v63 }
 0x925   : > { %2176 = vmatprep.subr.bf16.mxu0 %v2500_v0 }
 0x92a   : > { %v2330_v46 = vpop.eup %2329 }
 0x92b   : > { %v1398_v2 = vsel %vm859_vm9, %v2330_v46, 0.0 }
 0x92c   : > { %1399 = vadd.xlane.f32.xlu0 %v1398_v2 }
 0x942   : > { %1125 = vrot.lane.b32.xlu0 %v2887_v29, %s2511_s26 }
 0x9b9   : > { %v1400_v25 = vpop.xlane.xlu0 %1399 }
 0x9ba   : > { %2331 = vrcp.f32 %v1400_v25 }
 0x9bd   : > { %v1126_v3 = vpop.permute.xlu0 %1125 }
 0x9be   : > { %1129 = vst.msk [vmem:[#allocation2] sm:$0xff] %vm1128_vm10, %v1126_v3 }
 0x9bf   : > { %1308 = vst.msk [vmem:[#allocation2] sm:$0xff] %vm1307_vm11, %v1305_v4 }
 0x9c4   : > { %v2332_v5 = vpop.eup %2331 }
 0x9c5   : > { %v1402_v6 = vmul.f32 %v2332_v5, %v2330_v46 }
 0x9c7   : > { %2091 = vmatmul.mubr.msk.f32.vlgmr.msra.gmra.mrb[6].mxu0 %vm859_vm9, %v1402_v6 }
 0x9c8   : > { %2101 = vmatprep.mubr.msk.f32.mxu0 %vm2501_vm0, %v2502_v1  ;;  %2178 = vmatpush3.bf16.msra.mxu0 %v2177_v9 }
 0x9c9   : > { %2179 = vmatprep.subr.bf16.mxu0 %v2500_v0 }
 0x9cc   : > { %2181 = vmatpush3.bf16.msra.mxu0 %v2180_v12 }
 0x9cd   : > { %2188 = vmatprep.subr.bf16.mxu0 %v2500_v0 }
 0xa9a   : > { %v1478_v14 = vpop.f32.mrb[6].mxu0 }
 0xa9b   : > { %1483 = vrot.lane.b32.xlu1 %v1478_v14, %s2512_s11  ;;  %v2092_v15 = vpop.f32.mrb[7].mxu0  ;;  %v1956_v14 = vld [vmem:[%s3096_s29] ss:$0 sm:$0xff]  ;;  %s3097_s11 = sshll.u32 %s2768_s1, 3 }
 0xa9c   : > { %s565_s17 = scalar_lea.vmem [#allocation9], %s3097_s11 }
 0xa9d   : > { %s1823_s15 = sshll.u32 %s565_s17, 4  ;;  %s2996_s15 = int_to_ptr.vmem [resolvable:$true] %s1823_s15 }
 0xa9e   : > { %s2423_s30 = scalar_lea.vmem %s2996_s15, 128  ;;  %p2430_p7 = scmp.lt.s32.totalorder %s2996_s15, %s2428_s16 }
 0xa9f   : > { %p2424_p11 = scmp.ne.s32.totalorder %s2996_s15, %s2423_s30  ;;  %p2431_p9 = scmp.lt.s32.totalorder %s2429_s9, %s2423_s30 }
 0xaa1   : > { %p2425_p1 = pnand %p2424_p11, %p3099_p0  ;;  %p2432_p12 = por %p2431_p9, %p2430_p7 }
 0xaa3   : > { %p2426_p3 = pneg %p2425_p1 }
 0xaa5   : > { %p2433_p2 = pnand %p2432_p12, %p2426_p3 }
 0xb0d   : > { %v1484_v16 = vpop.permute.xlu1 %1483 }
 0xb0e   : > { %1487 = vst.msk [vmem:[#allocation2] sm:$0xff] %vm1486_vm12, %v1484_v16 }
 0xb15   : > { %v1488_v17 = vld [vmem:[#allocation2] sm:$0xff] }
 0xb16   : > { %2102 = vmatmul.mubr.msk.f32.vlgmr.msra.gmra.mrb[8].mxu0 %vm578_vm1, %v1488_v17 }
 0xb17   : > { %2131 = vmatprep.mubr.msk.f32.mxu0 %vm2501_vm0, %v2502_v1  ;;  %v1604_v1 = vld [vmem:[#allocation8] sm:$0xff] }
 0xb18   : > { %v2183_v33 = vpack.c.bf16 %v1605_v32, %v1604_v1 }
 0xb1a   : > { %2184 = vmatpush3.bf16.msra.mxu1 %v2183_v33 }
 0xb1b   : > { %2185 = vmatprep.subr.bf16.mxu1 %v2500_v0 }
 0xb1e   : > { %2187 = vmatpush3.bf16.msra.mxu1 %v2186_v36 }
 0xbe9   : > { %v1569_v19 = vpop.f32.mrb[8].mxu0 }
 0xbea   : > { %v1570_v20 = vadd.f32 %v1947_v18, %v1569_v19  ;;  %v2103_v21 = vpop.f32.mrb[9].mxu0 }
 0xbec   : > { %v1573_v22 = vadd.f32 %v1570_v20, %v2813_v13  ;;  %v1689_v13 = vld [vmem:[%s3049_s10] sm:$0xff] }
 0xbed   : > { %v2189_v39 = vpack.c.bf16 %v1690_v37, %v1689_v13 }
 0xbee   : > { %v1576_v23 = vsel %vm578_vm1, %v1573_v22, 0.0 }
 0xbef   : > { %1577 = vadd.xlane.f32.xlu1 %v1576_v23  ;;  %2190 = vmatpush3.bf16.msra.mxu0 %v2189_v39 }
 0xbf0   : > { %2191 = vmatprep.subr.bf16.mxu0 %v2500_v0 }
 0xbf3   : > { %2193 = vmatpush3.bf16.msra.mxu0 %v2192_v41 }
 0xbf4   : > { %2194 = vmatprep.subr.bf16.mxu0 %v2500_v0 }
 0xbf7   : > { %2196 = vmatpush3.bf16.msra.mxu0 %v2195_v44 }
 0xbf8   : > { %2197 = vmatprep.subr.bf16.mxu0 %v2500_v0  ;;  %v1695_v0 = vld [vmem:[%s3049_s10 + $0x30] sm:$0xff] }
 0xbf9   : > { %v2198_v55 = vpack.c.bf16 %v1696_v54, %v1695_v0 }
 0xbfb   : > { %2199 = vmatpush3.bf16.msra.mxu0 %v2198_v55 }
 0xc7c   : > { %v1578_v26 = vpop.xlane.xlu1 %1577 }
 0xc7d   : > { %v1580_v27 = vmul.f32 0.03125, %v1578_v26 }
 0xc7f   : > { %v1581_v29 = vsub.f32 %v1573_v22, %v1580_v27 }
 0xc81   : > { %v1582_v30 = vmul.f32 %v1581_v29, %v1581_v29 }
 0xc83   : > { %v1583_v31 = vsel %vm578_vm1, %v1582_v30, 0.0 }
 0xc84   : > { %1584 = vadd.xlane.f32.xlu0 %v1583_v31 }
 0xd11   : > { %v1585_v28 = vpop.xlane.xlu0 %1584 }
 0xd12   : > { %v1586_v45 = vmul.f32 0.03125, %v1585_v28 }
 0xd14   : > { %v1587_v47 = vadd.f32 1e-05, %v1586_v45 }
 0xd16   : > { %2333 = vrsqrt.f32 %v1587_v47 }
 0xd20   : > { %v2334_v48 = vpop.eup %2333 }
 0xd21   : > { %v1589_v50 = vmul.f32 %v2334_v48, %v1581_v29 }
 0xd23   : > { %v1596_v52 = vmul.f32 %v1949_v49, %v1589_v50 }
 0xd25   : > { %v1603_v53 = vadd.f32 %v1950_v51, %v1596_v52 }
 0xd27   : > { %2113 = vmatmul.mubr.msk.f32.vlgmr.msra.gmra.mrb[12].mxu1 %vm578_vm1, %v1603_v53 }
 0xdfa   : > { %v1684_v24 = vpop.f32.mrb[12].mxu1 }
 0xdfb   : > { %v1685_v57 = vadd.f32 %v1951_v56, %v1684_v24  ;;  %v2114_v58 = vpop.f32.mrb[13].mxu1 }
 0xdfd   : > { %v1688_v59 = vmax.f32 %v1685_v57, 0.0 }
 0xdff   : > { %2132 = vmatmul.mubr.msk.f32.vlgmr.msra.gmra.mrb[10].mxu0 %vm1704_vm13, %v1688_v59 }
 0xed2   : > { %v1774_v61 = vpop.f32.mrb[10].mxu0 }
 0xed3   : > { %v1775_v62 = vadd.f32 %v1953_v60, %v1774_v61  ;;  %v2133_v63 = vpop.f32.mrb[11].mxu0 }
 0xed5   : > { %v1778_v46 = vadd.f32 %v1775_v62, %v1603_v53 }
 0xed7   : > { %v1781_v2 = vsel %vm578_vm1, %v1778_v46, 0.0 }
 0xed8   : > { %1782 = vadd.xlane.f32.xlu1 %v1781_v2 }
 0xf65   : > { %v1783_v25 = vpop.xlane.xlu1 %1782 }
 0xf66   : > { %v1784_v3 = vmul.f32 0.03125, %v1783_v25 }
 0xf68   : > { %v1785_v4 = vsub.f32 %v1778_v46, %v1784_v3 }
 0xf6a   : > { %v1786_v5 = vmul.f32 %v1785_v4, %v1785_v4 }
 0xf6c   : > { %v1787_v6 = vsel %vm578_vm1, %v1786_v5, 0.0 }
 0xf6d   : > { %1788 = vadd.xlane.f32.xlu0 %v1787_v6 }
 0xffa   : > { %v1789_v7 = vpop.xlane.xlu0 %1788 }
 0xffb   : > { %v1790_v8 = vmul.f32 0.03125, %v1789_v7 }
 0xffd   : > { %v1791_v9 = vadd.f32 1e-05, %v1790_v8 }
 0xfff   : > { %2335 = vrsqrt.f32 %v1791_v9 }
0x1009   : > { %v2336_v10 = vpop.eup %2335 }
0x100a   : > { %v1793_v12 = vmul.f32 %v2336_v10, %v1785_v4 }
0x100c   : > { %v1800_v15 = vmul.f32 %v1955_v11, %v1793_v12 }
0x100e   : > { %v1807_v16 = vadd.f32 %v1956_v14, %v1800_v15 }
0x1010   : > { %1808 = vst.msk [vmem:[%s565_s17] sm:$0xff] %vm578_vm1, %v1807_v16 }
0x1011   : > { %2436 = shalt.err (!%p2433_p2)
}
0x1012   : > { %s2437_s1 = scalar_lea.hbm %s2994_s3, 128  ;;  %s2441_s0 = scalar_lea.hbm %s3098_s2, 256 }
0x1013   : > { %p2438_p13 = scmp.ne.s32.totalorder %s2994_s3, %s2437_s1  ;;  %p2442_p4 = scmp.lt.u32.totalorder %s2994_s3, %s3098_s2 }
0x1014   : > { %p2443_p5 = scmp.lt.u32.totalorder %s2441_s0, %s2437_s1  ;;  %p2445_p11 = scmp.lt.u32.totalorder %s2437_s1, %s2994_s3 }
0x1015   : > { %p2439_p6 = pnand %p2438_p13, %p3099_p0 }
0x1016   : > { %p2444_p8 = por %p2443_p5, %p2442_p4 }
0x1017   : > { %p2440_p10 = pneg %p2439_p6 }
0x1018   : > { %p2446_p1 = por %p2445_p11, %p2444_p8 }
0x101a   : > { %p2447_p3 = pnand %p2446_p1, %p2440_p10 }
0x101c   : > { %2450 = shalt.err (!%p2447_p3)
}
0x101d   : > { %2210 = dma.vmem_to_hbm [thread:$0]  (%p3099_p0), %s2996_s15, 128, %s2994_s3, %s1810_s19  }
0x101e PF: > { %s3100_s26 = sld [smem:[#allocation13_spill]]  ;;  %s3101_s21 = sld [smem:[#allocation14_spill]] }
0x101f   : > { %p3103_p9 = scmp.ge.s32.totalorder %s2493_s24, 2 }
0x1024   : > { %s1835_s30 = sand.u32 1, %s3100_s26   ;;  %p3102_p7 = scmp.ne.s32.totalorder %s3101_s21, 0 }
0x1025   : > { %s1836_s25 = scalar_lea.sflag [#allocation5], %s1835_s30 }
0x1026   : > { %p2224_p12 = pnand %p3103_p9, %p3102_p7 }
0x1028   : > { %2476 = dma.done.wait (!%p2224_p12), %s1836_s25, 128  }
0x1029   : > { %2478 = vsyncadd (!%p2224_p12), %s1836_s25, 4294967168  ;;  %p30_p2 = scmp.ge.s32.totalorder %s2709_s14, 4   ;;  %s3104_s21 = smov %s2485_s22 }
0x102a   : > { %s3105_s22 = smov %s2489_s23  ;;  %s3106_s23 = smov %s2725_s20 }
0x102b   : > { %s3107_s24 = smov %s2709_s14  ;;  %32 = sbr.rel (!%p30_p2) target bundleno = 16 (0x10), region = 137 }
0x1032   :  { %1841 = vsyncpa [#allocation4], 1 }
0x1033   :  { %1843 = vsyncpa [#allocation4 + $0x1], 1 }
0x1034   :  { %1844 = vsyncpa [#allocation7], 1 }
0x1035   :  { %1845 = vsyncpa [#allocation5], 1 }
0x1036   :  { %1847 = vsyncpa [#allocation5 + $0x1], 1 }

</bundles_post_ra>
